<compile_context>
chip_gen: v7x
topology: tpu7x:2x2x1
jax: 0.10.0
libtpu: 0.0.40
codegen_flags: <defaults>
</compile_context>

<pallas_src>
import functools

import numpy as np

import jax
import jax.numpy as jnp
from jax.experimental import pallas as pl
from jax.experimental.pallas import tpu as pltpu

LN_EPS = 1e-5
BN_EPS = 1e-5


# ---------------------------------------------------------------------------
# Kernel
# ---------------------------------------------------------------------------
def _asa_kernel(T, x_ref, mean_ref, seg_ref,
                wc1_ref, wc2_ref, wf_ref, w1_ref, w2_ref, w3_ref,
                bc1_ref, bc2_ref, bf_ref, b1_ref, b2_ref, b3_ref,
                out_ref):
    C, N = x_ref.shape                     # channels, folded lane extent (Bb*T)

    x2 = x_ref[...]                        # (C, N) f32, lane-dense

    # ---- segment-local edge masks: single iota, no per-batch concats --------
    pos = jax.lax.broadcasted_iota(jnp.int32, (1, N), 1) % T
    is_start = pos == 0
    is_end = pos == T - 1

    # ---- channel attention ---------------------------------------------------
    # per-segment means via one small f32 dot against a precomputed (N, Bb)
    # constant (no in-kernel iota/where construction of the averaging matrix).
    m = jnp.dot(x2, mean_ref[...], preferred_element_type=jnp.float32)   # (C, Bb)

    mu = jnp.mean(m, axis=0, keepdims=True)                              # (1, Bb)
    var = jnp.mean((m - mu) ** 2, axis=0, keepdims=True)
    m_n = (m - mu) * jax.lax.rsqrt(var + LN_EPS)   # LN affine folded into W1/b1

    def mlp_layer(w_ref_, b_ref_, act):            # bf16 MXU operands, f32 acc
        return jnp.dot(w_ref_[...], act.astype(jnp.bfloat16),
                       preferred_element_type=jnp.float32) + b_ref_[...]

    h = jnp.maximum(mlp_layer(w1_ref, b1_ref, m_n), 0.0)
    h = jnp.maximum(mlp_layer(w2_ref, b2_ref, h), 0.0)
    cw = jax.nn.sigmoid(mlp_layer(w3_ref, b3_ref, h))                    # (C, Bb)

    # broadcast per-segment channel weights across lanes with one tiny dot
    # against a precomputed 0/1 segment-indicator (Bb, N) constant.
    cw_full = jnp.dot(cw, seg_ref[...], preferred_element_type=jnp.float32)  # (C, N)

    # ---- spatial branch: 2 x [3-tap conv as ONE K=3C bf16 matmul -> BN(folded) -> ReLU]
    def conv3_bn_relu(hin, w_ref_, b_ref_):
        h_prev = jnp.where(is_start, 0.0, pltpu.roll(hin, shift=1, axis=1))
        h_next = jnp.where(is_end, 0.0, pltpu.roll(hin, shift=N - 1, axis=1))
        hcat = jnp.concatenate([h_prev, hin, h_next], axis=0)            # (3C, N)
        y = jnp.dot(w_ref_[...], hcat.astype(jnp.bfloat16),
                    preferred_element_type=jnp.float32) + b_ref_[...]
        return jnp.maximum(y, 0.0)

    s = conv3_bn_relu(x2, wc1_ref, bc1_ref)
    s = conv3_bn_relu(s, wc2_ref, bc2_ref)

    # ---- fusion: 1x1 conv over concat([x*cw, spatial]) as ONE K=2C bf16 matmul
    fin = jnp.concatenate([x2 * cw_full, s], axis=0)                     # (2C, N)
    fused = jnp.maximum(
        jnp.dot(wf_ref[...], fin.astype(jnp.bfloat16),
                preferred_element_type=jnp.float32) + bf_ref[...], 0.0)

    # single lane-dense unmasked store
    out_ref[...] = x2 + 0.1 * fused


# ---------------------------------------------------------------------------
# Wrapper
# ---------------------------------------------------------------------------
def _default_num_batch_blocks(B, T):
    """1 block on single-TC chips (v5e/v6e); 2 parallel blocks on v7x (2 TCs),
    provided each block keeps >=256 lanes and stays 128-lane aligned."""
    try:
        kind = jax.devices()[0].device_kind.lower()
    except Exception:
        kind = ""
    two_cores = ("v7" in kind) or ("tpu7" in kind)
    if two_cores and B % 2 == 0:
        Bb = B // 2
        if (Bb * T) % 128 == 0 and Bb * T >= 256:
            return 2
    return 1


@functools.partial(jax.jit, static_argnames=("num_batch_blocks",))
def _asa_impl(x_btc, params, *, num_batch_blocks):
    B, T, C = x_btc.shape
    nb = num_batch_blocks
    assert B % nb == 0, (B, nb)
    Bb = B // nb
    N_blk = Bb * T
    assert C % 8 == 0, "C must be a multiple of 8 (sublane tile alignment)"
    if nb > 1:
        assert N_blk % 128 == 0, "per-block lane extent must be a multiple of 128"

    # Single wrapper-side relayout to the kernel's lane-dense layout:
    # (B, T, C) -> (C, B, T) -> (C, B*T).  Output is relaid back below.
    x_cn = jnp.transpose(x_btc, (2, 0, 1)).reshape(C, B * T)

    # Host-precomputed per-block segment constants (static Bb/T -> baked in).
    seg_ids = np.arange(N_blk) // T
    onehot = (seg_ids[None, :] == np.arange(Bb)[:, None]).astype(np.float32)
    mean_mat = jnp.asarray(onehot.T / float(T), jnp.float32)   # (N_blk, Bb)
    seg_mat = jnp.asarray(onehot, jnp.float32)                 # (Bb, N_blk)

    (wc1, wc2, wf, w1, w2, w3, bc1, bc2, bfv, b1, b2, b3) = params

    def full(a):   # whole-array block, grid-invariant
        return pl.BlockSpec(a.shape, lambda i: (0,) * a.ndim)

    out_cn = pl.pallas_call(
        functools.partial(_asa_kernel, T),
        out_shape=jax.ShapeDtypeStruct((C, B * T), jnp.float32),
        grid=(nb,),
        in_specs=[
            pl.BlockSpec((C, N_blk), lambda i: (0, i)),        # x (lane-dense)
            full(mean_mat), full(seg_mat),
            full(wc1), full(wc2), full(wf), full(w1), full(w2), full(w3),
            full(bc1), full(bc2), full(bfv), full(b1), full(b2), full(b3),
        ],
        out_specs=pl.BlockSpec((C, N_blk), lambda i: (0, i)),
        compiler_params=pltpu.CompilerParams(dimension_semantics=("parallel",)),
    )(x_cn, mean_mat, seg_mat, wc1, wc2, wf, w1, w2, w3,
      bc1, bc2, bfv, b1, b2, b3)

    # back to the torch module's (B, C, T) output layout
    return jnp.transpose(out_cn.reshape(C, B, T), (1, 0, 2))


def adjustable_spatial_attention(x_btc, params, *, num_batch_blocks=None):
    """x_btc: (B, T, C) f32 -> (B, C, T) f32 (same output layout as the torch module)."""
    B, T, C = x_btc.shape
    if num_batch_blocks is None:
        num_batch_blocks = _default_num_batch_blocks(B, T)
    return _asa_impl(x_btc, params, num_batch_blocks=num_batch_blocks)


# ---------------------------------------------------------------------------
# Host-side parameter packing (fold LN affine + eval-mode BN; bf16 MXU weights)
# ---------------------------------------------------------------------------
def pack_params(raw):
    C = raw["wc1"].shape[0]
    lng, lnb = raw["ln"]

    # LayerNorm affine folded into the first MLP linear.
    w1f = raw["w1"] * lng[None, :]                   # (Cr, C)
    b1f = raw["b1"] + raw["w1"] @ lnb                # (Cr,)

    def pad_sq(w):                                   # zero-pad to (C, C)
        return jnp.zeros((C, C), jnp.float32).at[:w.shape[0], :w.shape[1]].set(w)

    def col(v):                                      # zero-pad to (C, 1) column
        return jnp.zeros((C,), jnp.float32).at[:v.shape[0]].set(v)[:, None]

    def fold_bn(Wmat, bvec, bn):                     # BN (eval) into weight/bias
        g, beta, mean, var = bn
        s = g / jnp.sqrt(var + BN_EPS)
        return Wmat * s[:, None], s * (bvec - mean) + beta

    Wc1 = jnp.concatenate([raw["wc1"][:, :, k] for k in range(3)], axis=1)   # (C, 3C)
    Wc2 = jnp.concatenate([raw["wc2"][:, :, k] for k in range(3)], axis=1)
    Wf = raw["wf"][:, :, 0]                                                  # (C, 2C)
    Wc1, bc1 = fold_bn(Wc1, raw["bc1"], raw["bn1"])
    Wc2, bc2 = fold_bn(Wc2, raw["bc2"], raw["bn2"])
    Wf, bfv = fold_bn(Wf, raw["bf"], raw["bnf"])

    bf16 = lambda a: a.astype(jnp.bfloat16)
    f32c = lambda v: v.astype(jnp.float32)[:, None]
    return (bf16(Wc1), bf16(Wc2), bf16(Wf),
            bf16(pad_sq(w1f)), bf16(pad_sq(raw["w2"])), bf16(pad_sq(raw["w3"])),
            f32c(bc1), f32c(bc2), f32c(bfv),
            col(b1f), col(raw["b2"]), f32c(raw["b3"]))


def init_params(key, C, reduction_ratio=4):
    """Deterministic synthetic init matching the torch module's shapes / init recipe."""
    Cr = C // reduction_ratio
    ks = jax.random.split(key, 6)

    def xavier(k, shape):                            # Linear (out, in), gain=0.5
        fan_out, fan_in = shape
        std = 0.5 * (2.0 / (fan_in + fan_out)) ** 0.5
        return std * jax.random.normal(k, shape, jnp.float32)

    def kaiming_conv(k, shape):                      # Conv1d (out, in, k), fan_out/relu
        fan_out = shape[0] * shape[2]
        std = (2.0 / fan_out) ** 0.5
        return std * jax.random.normal(k, shape, jnp.float32)

    def bn_default(c):                               # fresh BatchNorm1d (eval)
        return (jnp.ones((c,), jnp.float32), jnp.zeros((c,), jnp.float32),
                jnp.zeros((c,), jnp.float32), jnp.ones((c,), jnp.float32))

    return {
        "ln": (jnp.ones((C,), jnp.float32), jnp.zeros((C,), jnp.float32)),
        "w1": xavier(ks[0], (Cr, C)), "b1": jnp.zeros((Cr,), jnp.float32),
        "w2": xavier(ks[1], (Cr, Cr)), "b2": jnp.zeros((Cr,), jnp.float32),
        "w3": xavier(ks[2], (C, Cr)), "b3": jnp.zeros((C,), jnp.float32),
        "wc1": kaiming_conv(ks[3], (C, C, 3)), "bc1": jnp.zeros((C,), jnp.float32),
        "bn1": bn_default(C),
        "wc2": kaiming_conv(ks[4], (C, C, 3)), "bc2": jnp.zeros((C,), jnp.float32),
        "bn2": bn_default(C),
        "wf": kaiming_conv(ks[5], (C, 2 * C, 1)), "bf": jnp.zeros((C,), jnp.float32),
        "bnf": bn_default(C),
    }


# ---------------------------------------------------------------------------
# Pure-JAX reference (mirrors the torch forward, BN in eval mode, full f32)
# ---------------------------------------------------------------------------
def reference(x_btc, raw):
    x = jnp.transpose(x_btc, (0, 2, 1))              # (B, C, T)
    lng, lnb = raw["ln"]

    m = x.mean(axis=2)                               # (B, C)
    mu = m.mean(axis=1, keepdims=True)
    var = ((m - mu) ** 2).mean(axis=1, keepdims=True)
    mn = (m - mu) / jnp.sqrt(var + LN_EPS) * lng + lnb
    h = jax.nn.relu(mn @ raw["w1"].T + raw["b1"])
    h = jax.nn.relu(h @ raw["w2"].T + raw["b2"])
    cw = jax.nn.sigmoid(h @ raw["w3"].T + raw["b3"])[:, :, None]   # (B, C, 1)

    def bn_eval(z, bn):
        g, b, mean, var_ = bn
        s = g / jnp.sqrt(var_ + BN_EPS)
        return z * s[None, :, None] + (b - mean * s)[None, :, None]

    def conv3(hin, w, b):
        hp = jnp.pad(hin, ((0, 0), (0, 0), (1, 0)))[:, :, :-1]
        hn = jnp.pad(hin, ((0, 0), (0, 0), (0, 1)))[:, :, 1:]
        return (jnp.einsum('oc,bct->bot', w[:, :, 0], hp)
                + jnp.einsum('oc,bct->bot', w[:, :, 1], hin)
                + jnp.einsum('oc,bct->bot', w[:, :, 2], hn)
                + b[None, :, None])

    s = jax.nn.relu(bn_eval(conv3(x, raw["wc1"], raw["bc1"]), raw["bn1"]))
    s = jax.nn.relu(bn_eval(conv3(s, raw["wc2"], raw["bc2"]), raw["bn2"]))
    concat = jnp.concatenate([x * cw, s], axis=1)
    z = jnp.einsum('oc,bct->bot', raw["wf"][:, :, 0], concat) + raw["bf"][None, :, None]
    fused = jax.nn.relu(bn_eval(z, raw["bnf"]))
    return x + 0.1 * fused


if __name__ == "__main__":
    B, T, C = 4, 128, 16                             # (batch, seq, EEG channels)
    key = jax.random.PRNGKey(0)
    kx, kp = jax.random.split(key)
    x = jax.random.normal(kx, (B, T, C), jnp.float32)
    raw = init_params(kp, C, reduction_ratio=4)
    params = pack_params(raw)

    out = adjustable_spatial_attention(x, params)
    out = jax.block_until_ready(out)

    ref = reference(x, raw)
    assert out.shape == (B, C, T), out.shape
    max_err = float(jnp.max(jnp.abs(out - ref)))
    # bf16 MXU operands -> ~1e-3 expected deviation; 2e-2 still catches real bugs
    # (a wrong branch shows up at >= 0.1 because of the +0.1*out residual).
    assert max_err < 2e-2, f"max abs err {max_err}"
    print("KERNEL_OK")
</pallas_src>

<mosaic_0001>
module attributes {stable_mosaic.version = 11 : i64} {
  func.func @_asa_kernel(%arg0: i32, %arg1: memref<16x512xf32, #tpu.memory_space<vmem>>, %arg2: memref<512x4xf32, #tpu.memory_space<vmem>>, %arg3: memref<4x512xf32, #tpu.memory_space<vmem>>, %arg4: memref<16x48xbf16, #tpu.memory_space<vmem>>, %arg5: memref<16x48xbf16, #tpu.memory_space<vmem>>, %arg6: memref<16x32xbf16, #tpu.memory_space<vmem>>, %arg7: memref<16x16xbf16, #tpu.memory_space<vmem>>, %arg8: memref<16x16xbf16, #tpu.memory_space<vmem>>, %arg9: memref<16x16xbf16, #tpu.memory_space<vmem>>, %arg10: memref<16x1xf32, #tpu.memory_space<vmem>>, %arg11: memref<16x1xf32, #tpu.memory_space<vmem>>, %arg12: memref<16x1xf32, #tpu.memory_space<vmem>>, %arg13: memref<16x1xf32, #tpu.memory_space<vmem>>, %arg14: memref<16x1xf32, #tpu.memory_space<vmem>>, %arg15: memref<16x1xf32, #tpu.memory_space<vmem>>, %arg16: memref<16x512xf32, #tpu.memory_space<vmem>>) attributes {dimension_semantics = [#tpu.dimension_semantics<parallel>], iteration_bounds = array<i64: 1>, scalar_prefetch = 0 : i64, scratch_operands = 0 : i64, tpu.core_type = #tpu.core_type<tc>, window_params = [{transform_indices = @transform_0, window_bounds = array<i64: 16, 512>}, {pipeline_mode = #tpu.pipeline_mode<synchronous>, transform_indices = @transform_1, window_bounds = array<i64: 512, 4>}, {pipeline_mode = #tpu.pipeline_mode<synchronous>, transform_indices = @transform_2, window_bounds = array<i64: 4, 512>}, {pipeline_mode = #tpu.pipeline_mode<synchronous>, transform_indices = @transform_3, window_bounds = array<i64: 16, 48>}, {pipeline_mode = #tpu.pipeline_mode<synchronous>, transform_indices = @transform_4, window_bounds = array<i64: 16, 48>}, {pipeline_mode = #tpu.pipeline_mode<synchronous>, transform_indices = @transform_5, window_bounds = array<i64: 16, 32>}, {pipeline_mode = #tpu.pipeline_mode<synchronous>, transform_indices = @transform_6, window_bounds = array<i64: 16, 16>}, {pipeline_mode = #tpu.pipeline_mode<synchronous>, transform_indices = @transform_7, window_bounds = array<i64: 16, 16>}, {pipeline_mode = #tpu.pipeline_mode<synchronous>, transform_indices = @transform_8, window_bounds = array<i64: 16, 16>}, {pipeline_mode = #tpu.pipeline_mode<synchronous>, transform_indices = @transform_9, window_bounds = array<i64: 16, 1>}, {pipeline_mode = #tpu.pipeline_mode<synchronous>, transform_indices = @transform_10, window_bounds = array<i64: 16, 1>}, {pipeline_mode = #tpu.pipeline_mode<synchronous>, transform_indices = @transform_11, window_bounds = array<i64: 16, 1>}, {pipeline_mode = #tpu.pipeline_mode<synchronous>, transform_indices = @transform_12, window_bounds = array<i64: 16, 1>}, {pipeline_mode = #tpu.pipeline_mode<synchronous>, transform_indices = @transform_13, window_bounds = array<i64: 16, 1>}, {pipeline_mode = #tpu.pipeline_mode<synchronous>, transform_indices = @transform_14, window_bounds = array<i64: 16, 1>}, {transform_indices = @transform_15, window_bounds = array<i64: 16, 512>}]} {
    %c0 = arith.constant 0 : index
    %c0_0 = arith.constant 0 : index
    %0 = vector.load %arg1[%c0, %c0_0] : memref<16x512xf32, #tpu.memory_space<vmem>>, vector<16x512xf32>
    %1 = tpu.iota {dimensions = array<i32: 1>} : vector<1x512xi32>
    %c128_i32 = arith.constant 128 : i32
    %c0_i32 = arith.constant 0 : i32
    %2 = arith.cmpi eq, %c128_i32, %c0_i32 : i32
    %c1_i32 = arith.constant 1 : i32
    %3 = arith.select %2, %c1_i32, %c128_i32 : i32
    %4 = vector.broadcast %3 : i32 to vector<1x512xi32>
    %5 = arith.remsi %1, %4 : vector<1x512xi32>
    %c0_i32_1 = arith.constant 0 : i32
    %6 = vector.broadcast %c0_i32_1 : i32 to vector<1x512xi32>
    %7 = arith.cmpi ne, %5, %6 : vector<1x512xi32>
    %c0_i32_2 = arith.constant 0 : i32
    %8 = vector.broadcast %c0_i32_2 : i32 to vector<1x512xi32>
    %9 = arith.cmpi slt, %5, %8 : vector<1x512xi32>
    %c0_i32_3 = arith.constant 0 : i32
    %10 = arith.cmpi slt, %3, %c0_i32_3 : i32
    %11 = vector.broadcast %10 : i1 to vector<1x512xi1>
    %12 = vector.broadcast %11 : vector<1x512xi1> to vector<1x512xi1>
    %13 = arith.xori %9, %12 : vector<1x512xi1>
    %14 = arith.andi %13, %7 : vector<1x512xi1>
    %15 = vector.broadcast %3 : i32 to vector<1x512xi32>
    %16 = arith.addi %5, %15 : vector<1x512xi32>
    %17 = arith.select %14, %16, %5 : vector<1x512xi1>, vector<1x512xi32>
    %c0_i32_4 = arith.constant 0 : i32
    %18 = vector.broadcast %c0_i32_4 : i32 to vector<1x512xi32>
    %19 = arith.cmpi eq, %17, %18 : vector<1x512xi32>
    %c127_i32 = arith.constant 127 : i32
    %20 = vector.broadcast %c127_i32 : i32 to vector<1x512xi32>
    %21 = arith.cmpi eq, %17, %20 : vector<1x512xi32>
    %c0_5 = arith.constant 0 : index
    %c0_6 = arith.constant 0 : index
    %22 = vector.load %arg2[%c0_5, %c0_6] : memref<512x4xf32, #tpu.memory_space<vmem>>, vector<512x4xf32>
    %cst = arith.constant dense<0.000000e+00> : vector<16x4xf32>
    %23 = tpu.matmul %0, %22, %cst {dimension_numbers = #tpu.dot_dimension_numbers<[1], [0], [0], [1], [0, 0, 1, 1], [], []>} : vector<16x512xf32>, vector<512x4xf32>, vector<16x4xf32> -> vector<16x4xf32>
    %cst_7 = arith.constant dense<0.000000e+00> : vector<4xf32>
    %24 = vector.multi_reduction <add>, %23, %cst_7 [0] : vector<16x4xf32> to vector<4xf32>
    %25 = vector.shape_cast %24 : vector<4xf32> to vector<1x4xf32>
    %cst_8 = arith.constant 1.600000e+01 : f32
    %26 = vector.broadcast %cst_8 : f32 to vector<1x4xf32>
    %27 = arith.divf %25, %26 : vector<1x4xf32>
    %28 = vector.broadcast %27 : vector<1x4xf32> to vector<16x4xf32>
    %29 = arith.subf %23, %28 : vector<16x4xf32>
    %30 = arith.mulf %29, %29 : vector<16x4xf32>
    %cst_9 = arith.constant dense<0.000000e+00> : vector<4xf32>
    %31 = vector.multi_reduction <add>, %30, %cst_9 [0] : vector<16x4xf32> to vector<4xf32>
    %32 = vector.shape_cast %31 : vector<4xf32> to vector<1x4xf32>
    %cst_10 = arith.constant 1.600000e+01 : f32
    %33 = vector.broadcast %cst_10 : f32 to vector<1x4xf32>
    %34 = arith.divf %32, %33 : vector<1x4xf32>
    %35 = vector.broadcast %27 : vector<1x4xf32> to vector<16x4xf32>
    %36 = arith.subf %23, %35 : vector<16x4xf32>
    %cst_11 = arith.constant 9.99999974E-6 : f32
    %37 = vector.broadcast %cst_11 : f32 to vector<1x4xf32>
    %38 = arith.addf %34, %37 : vector<1x4xf32>
    %39 = math.rsqrt %38 : vector<1x4xf32>
    %40 = vector.broadcast %39 : vector<1x4xf32> to vector<16x4xf32>
    %41 = arith.mulf %36, %40 : vector<16x4xf32>
    %c0_12 = arith.constant 0 : index
    %c0_13 = arith.constant 0 : index
    %42 = vector.load %arg7[%c0_12, %c0_13] : memref<16x16xbf16, #tpu.memory_space<vmem>>, vector<16x16xbf16>
    %43 = arith.truncf %41 : vector<16x4xf32> to vector<16x4xbf16>
    %cst_14 = arith.constant dense<0.000000e+00> : vector<16x4xf32>
    %44 = tpu.matmul %42, %43, %cst_14 {dimension_numbers = #tpu.dot_dimension_numbers<[1], [0], [0], [1], [0, 0, 1, 1], [], []>} : vector<16x16xbf16>, vector<16x4xbf16>, vector<16x4xf32> -> vector<16x4xf32>
    %c0_15 = arith.constant 0 : index
    %c0_16 = arith.constant 0 : index
    %45 = vector.load %arg13[%c0_15, %c0_16] : memref<16x1xf32, #tpu.memory_space<vmem>>, vector<16x1xf32>
    %46 = vector.broadcast %45 : vector<16x1xf32> to vector<16x4xf32>
    %47 = arith.addf %44, %46 : vector<16x4xf32>
    %cst_17 = arith.constant 0.000000e+00 : f32
    %48 = vector.broadcast %cst_17 : f32 to vector<16x4xf32>
    %49 = arith.maximumf %47, %48 : vector<16x4xf32>
    %c0_18 = arith.constant 0 : index
    %c0_19 = arith.constant 0 : index
    %50 = vector.load %arg8[%c0_18, %c0_19] : memref<16x16xbf16, #tpu.memory_space<vmem>>, vector<16x16xbf16>
    %51 = arith.truncf %49 : vector<16x4xf32> to vector<16x4xbf16>
    %cst_20 = arith.constant dense<0.000000e+00> : vector<16x4xf32>
    %52 = tpu.matmul %50, %51, %cst_20 {dimension_numbers = #tpu.dot_dimension_numbers<[1], [0], [0], [1], [0, 0, 1, 1], [], []>} : vector<16x16xbf16>, vector<16x4xbf16>, vector<16x4xf32> -> vector<16x4xf32>
    %c0_21 = arith.constant 0 : index
    %c0_22 = arith.constant 0 : index
    %53 = vector.load %arg14[%c0_21, %c0_22] : memref<16x1xf32, #tpu.memory_space<vmem>>, vector<16x1xf32>
    %54 = vector.broadcast %53 : vector<16x1xf32> to vector<16x4xf32>
    %55 = arith.addf %52, %54 : vector<16x4xf32>
    %cst_23 = arith.constant 0.000000e+00 : f32
    %56 = vector.broadcast %cst_23 : f32 to vector<16x4xf32>
    %57 = arith.maximumf %55, %56 : vector<16x4xf32>
    %c0_24 = arith.constant 0 : index
    %c0_25 = arith.constant 0 : index
    %58 = vector.load %arg9[%c0_24, %c0_25] : memref<16x16xbf16, #tpu.memory_space<vmem>>, vector<16x16xbf16>
    %59 = arith.truncf %57 : vector<16x4xf32> to vector<16x4xbf16>
    %cst_26 = arith.constant dense<0.000000e+00> : vector<16x4xf32>
    %60 = tpu.matmul %58, %59, %cst_26 {dimension_numbers = #tpu.dot_dimension_numbers<[1], [0], [0], [1], [0, 0, 1, 1], [], []>} : vector<16x16xbf16>, vector<16x4xbf16>, vector<16x4xf32> -> vector<16x4xf32>
    %c0_27 = arith.constant 0 : index
    %c0_28 = arith.constant 0 : index
    %61 = vector.load %arg15[%c0_27, %c0_28] : memref<16x1xf32, #tpu.memory_space<vmem>>, vector<16x1xf32>
    %62 = vector.broadcast %61 : vector<16x1xf32> to vector<16x4xf32>
    %63 = arith.addf %60, %62 : vector<16x4xf32>
    %64 = arith.negf %63 : vector<16x4xf32>
    %65 = math.exp %64 : vector<16x4xf32>
    %cst_29 = arith.constant 1.000000e+00 : f32
    %66 = vector.broadcast %cst_29 : f32 to vector<16x4xf32>
    %67 = arith.addf %66, %65 : vector<16x4xf32>
    %68 = arith.divf %66, %67 : vector<16x4xf32>
    %c0_30 = arith.constant 0 : index
    %c0_31 = arith.constant 0 : index
    %69 = vector.load %arg3[%c0_30, %c0_31] : memref<4x512xf32, #tpu.memory_space<vmem>>, vector<4x512xf32>
    %cst_32 = arith.constant dense<0.000000e+00> : vector<16x512xf32>
    %70 = tpu.matmul %68, %69, %cst_32 {dimension_numbers = #tpu.dot_dimension_numbers<[1], [0], [0], [1], [0, 0, 1, 1], [], []>} : vector<16x4xf32>, vector<4x512xf32>, vector<16x512xf32> -> vector<16x512xf32>
    %c1_i32_33 = arith.constant 1 : i32
    %71 = tpu.dynamic_rotate %0 by %c1_i32_33 dim 1 : vector<16x512xf32>, i32 -> vector<16x512xf32>
    %cst_34 = arith.constant 0.000000e+00 : f32
    %72 = vector.shape_cast %19 : vector<1x512xi1> to vector<1x512xi1>
    %73 = vector.broadcast %72 : vector<1x512xi1> to vector<16x512xi1>
    %74 = vector.broadcast %cst_34 : f32 to vector<16x512xf32>
    %75 = arith.select %73, %74, %71 : vector<16x512xi1>, vector<16x512xf32>
    %c511_i32 = arith.constant 511 : i32
    %76 = tpu.dynamic_rotate %0 by %c511_i32 dim 1 : vector<16x512xf32>, i32 -> vector<16x512xf32>
    %cst_35 = arith.constant 0.000000e+00 : f32
    %77 = vector.shape_cast %21 : vector<1x512xi1> to vector<1x512xi1>
    %78 = vector.broadcast %77 : vector<1x512xi1> to vector<16x512xi1>
    %79 = vector.broadcast %cst_35 : f32 to vector<16x512xf32>
    %80 = arith.select %78, %79, %76 : vector<16x512xi1>, vector<16x512xf32>
    %81 = tpu.concatenate %75, %0, %80 in 0 : vector<16x512xf32>, vector<16x512xf32>, vector<16x512xf32> -> vector<48x512xf32>
    %c0_36 = arith.constant 0 : index
    %c0_37 = arith.constant 0 : index
    %82 = vector.load %arg4[%c0_36, %c0_37] : memref<16x48xbf16, #tpu.memory_space<vmem>>, vector<16x48xbf16>
    %83 = arith.truncf %81 : vector<48x512xf32> to vector<48x512xbf16>
    %cst_38 = arith.constant dense<0.000000e+00> : vector<16x512xf32>
    %84 = tpu.matmul %82, %83, %cst_38 {dimension_numbers = #tpu.dot_dimension_numbers<[1], [0], [0], [1], [0, 0, 1, 1], [], []>} : vector<16x48xbf16>, vector<48x512xbf16>, vector<16x512xf32> -> vector<16x512xf32>
    %c0_39 = arith.constant 0 : index
    %c0_40 = arith.constant 0 : index
    %85 = vector.load %arg10[%c0_39, %c0_40] : memref<16x1xf32, #tpu.memory_space<vmem>>, vector<16x1xf32>
    %86 = vector.broadcast %85 : vector<16x1xf32> to vector<16x512xf32>
    %87 = arith.addf %84, %86 : vector<16x512xf32>
    %cst_41 = arith.constant 0.000000e+00 : f32
    %88 = vector.broadcast %cst_41 : f32 to vector<16x512xf32>
    %89 = arith.maximumf %87, %88 : vector<16x512xf32>
    %c1_i32_42 = arith.constant 1 : i32
    %90 = tpu.dynamic_rotate %89 by %c1_i32_42 dim 1 : vector<16x512xf32>, i32 -> vector<16x512xf32>
    %cst_43 = arith.constant 0.000000e+00 : f32
    %91 = vector.shape_cast %19 : vector<1x512xi1> to vector<1x512xi1>
    %92 = vector.broadcast %91 : vector<1x512xi1> to vector<16x512xi1>
    %93 = vector.broadcast %cst_43 : f32 to vector<16x512xf32>
    %94 = arith.select %92, %93, %90 : vector<16x512xi1>, vector<16x512xf32>
    %c511_i32_44 = arith.constant 511 : i32
    %95 = tpu.dynamic_rotate %89 by %c511_i32_44 dim 1 : vector<16x512xf32>, i32 -> vector<16x512xf32>
    %cst_45 = arith.constant 0.000000e+00 : f32
    %96 = vector.shape_cast %21 : vector<1x512xi1> to vector<1x512xi1>
    %97 = vector.broadcast %96 : vector<1x512xi1> to vector<16x512xi1>
    %98 = vector.broadcast %cst_45 : f32 to vector<16x512xf32>
    %99 = arith.select %97, %98, %95 : vector<16x512xi1>, vector<16x512xf32>
    %100 = tpu.concatenate %94, %89, %99 in 0 : vector<16x512xf32>, vector<16x512xf32>, vector<16x512xf32> -> vector<48x512xf32>
    %c0_46 = arith.constant 0 : index
    %c0_47 = arith.constant 0 : index
    %101 = vector.load %arg5[%c0_46, %c0_47] : memref<16x48xbf16, #tpu.memory_space<vmem>>, vector<16x48xbf16>
    %102 = arith.truncf %100 : vector<48x512xf32> to vector<48x512xbf16>
    %cst_48 = arith.constant dense<0.000000e+00> : vector<16x512xf32>
    %103 = tpu.matmul %101, %102, %cst_48 {dimension_numbers = #tpu.dot_dimension_numbers<[1], [0], [0], [1], [0, 0, 1, 1], [], []>} : vector<16x48xbf16>, vector<48x512xbf16>, vector<16x512xf32> -> vector<16x512xf32>
    %c0_49 = arith.constant 0 : index
    %c0_50 = arith.constant 0 : index
    %104 = vector.load %arg11[%c0_49, %c0_50] : memref<16x1xf32, #tpu.memory_space<vmem>>, vector<16x1xf32>
    %105 = vector.broadcast %104 : vector<16x1xf32> to vector<16x512xf32>
    %106 = arith.addf %103, %105 : vector<16x512xf32>
    %cst_51 = arith.constant 0.000000e+00 : f32
    %107 = vector.broadcast %cst_51 : f32 to vector<16x512xf32>
    %108 = arith.maximumf %106, %107 : vector<16x512xf32>
    %109 = arith.mulf %0, %70 : vector<16x512xf32>
    %110 = tpu.concatenate %109, %108 in 0 : vector<16x512xf32>, vector<16x512xf32> -> vector<32x512xf32>
    %c0_52 = arith.constant 0 : index
    %c0_53 = arith.constant 0 : index
    %111 = vector.load %arg6[%c0_52, %c0_53] : memref<16x32xbf16, #tpu.memory_space<vmem>>, vector<16x32xbf16>
    %112 = arith.truncf %110 : vector<32x512xf32> to vector<32x512xbf16>
    %cst_54 = arith.constant dense<0.000000e+00> : vector<16x512xf32>
    %113 = tpu.matmul %111, %112, %cst_54 {dimension_numbers = #tpu.dot_dimension_numbers<[1], [0], [0], [1], [0, 0, 1, 1], [], []>} : vector<16x32xbf16>, vector<32x512xbf16>, vector<16x512xf32> -> vector<16x512xf32>
    %c0_55 = arith.constant 0 : index
    %c0_56 = arith.constant 0 : index
    %114 = vector.load %arg12[%c0_55, %c0_56] : memref<16x1xf32, #tpu.memory_space<vmem>>, vector<16x1xf32>
    %115 = vector.broadcast %114 : vector<16x1xf32> to vector<16x512xf32>
    %116 = arith.addf %113, %115 : vector<16x512xf32>
    %cst_57 = arith.constant 0.000000e+00 : f32
    %117 = vector.broadcast %cst_57 : f32 to vector<16x512xf32>
    %118 = arith.maximumf %116, %117 : vector<16x512xf32>
    %cst_58 = arith.constant 1.000000e-01 : f32
    %119 = vector.broadcast %cst_58 : f32 to vector<16x512xf32>
    %120 = arith.mulf %119, %118 : vector<16x512xf32>
    %121 = arith.addf %0, %120 : vector<16x512xf32>
    %c0_59 = arith.constant 0 : index
    %c0_60 = arith.constant 0 : index
    %122 = vector.load %arg16[%c0_59, %c0_60] : memref<16x512xf32, #tpu.memory_space<vmem>>, vector<16x512xf32>
    tpu.vector_store %arg16[%c0_59, %c0_60], %121 {strides = array<i32>} : memref<16x512xf32, #tpu.memory_space<vmem>>, vector<16x512xf32>,
    return
  }
  func.func @transform_0(%arg0: i32) -> (i32, i32) {
    %c0_i32 = arith.constant 0 : i32
    %c0_i32_0 = arith.constant 0 : i32
    return %c0_i32, %arg0 : i32, i32
  }
  func.func @transform_1(%arg0: i32) -> (i32, i32) {
    %c0_i32 = arith.constant 0 : i32
    %c0_i32_0 = arith.constant 0 : i32
    %c0_i32_1 = arith.constant 0 : i32
    return %c0_i32, %c0_i32_0 : i32, i32
  }
  func.func @transform_2(%arg0: i32) -> (i32, i32) {
    %c0_i32 = arith.constant 0 : i32
    %c0_i32_0 = arith.constant 0 : i32
    %c0_i32_1 = arith.constant 0 : i32
    return %c0_i32, %c0_i32_0 : i32, i32
  }
  func.func @transform_3(%arg0: i32) -> (i32, i32) {
    %c0_i32 = arith.constant 0 : i32
    %c0_i32_0 = arith.constant 0 : i32
    %c0_i32_1 = arith.constant 0 : i32
    return %c0_i32, %c0_i32_0 : i32, i32
  }
  func.func @transform_4(%arg0: i32) -> (i32, i32) {
    %c0_i32 = arith.constant 0 : i32
    %c0_i32_0 = arith.constant 0 : i32
    %c0_i32_1 = arith.constant 0 : i32
    return %c0_i32, %c0_i32_0 : i32, i32
  }
  func.func @transform_5(%arg0: i32) -> (i32, i32) {
    %c0_i32 = arith.constant 0 : i32
    %c0_i32_0 = arith.constant 0 : i32
    %c0_i32_1 = arith.constant 0 : i32
    return %c0_i32, %c0_i32_0 : i32, i32
  }
  func.func @transform_6(%arg0: i32) -> (i32, i32) {
    %c0_i32 = arith.constant 0 : i32
    %c0_i32_0 = arith.constant 0 : i32
    %c0_i32_1 = arith.constant 0 : i32
    return %c0_i32, %c0_i32_0 : i32, i32
  }
  func.func @transform_7(%arg0: i32) -> (i32, i32) {
    %c0_i32 = arith.constant 0 : i32
    %c0_i32_0 = arith.constant 0 : i32
    %c0_i32_1 = arith.constant 0 : i32
    return %c0_i32, %c0_i32_0 : i32, i32
  }
  func.func @transform_8(%arg0: i32) -> (i32, i32) {
    %c0_i32 = arith.constant 0 : i32
    %c0_i32_0 = arith.constant 0 : i32
    %c0_i32_1 = arith.constant 0 : i32
    return %c0_i32, %c0_i32_0 : i32, i32
  }
  func.func @transform_9(%arg0: i32) -> (i32, i32) {
    %c0_i32 = arith.constant 0 : i32
    %c0_i32_0 = arith.constant 0 : i32
    %c0_i32_1 = arith.constant 0 : i32
    return %c0_i32, %c0_i32_0 : i32, i32
  }
  func.func @transform_10(%arg0: i32) -> (i32, i32) {
    %c0_i32 = arith.constant 0 : i32
    %c0_i32_0 = arith.constant 0 : i32
    %c0_i32_1 = arith.constant 0 : i32
    return %c0_i32, %c0_i32_0 : i32, i32
  }
  func.func @transform_11(%arg0: i32) -> (i32, i32) {
    %c0_i32 = arith.constant 0 : i32
    %c0_i32_0 = arith.constant 0 : i32
    %c0_i32_1 = arith.constant 0 : i32
    return %c0_i32, %c0_i32_0 : i32, i32
  }
  func.func @transform_12(%arg0: i32) -> (i32, i32) {
    %c0_i32 = arith.constant 0 : i32
    %c0_i32_0 = arith.constant 0 : i32
    %c0_i32_1 = arith.constant 0 : i32
    return %c0_i32, %c0_i32_0 : i32, i32
  }
  func.func @transform_13(%arg0: i32) -> (i32, i32) {
    %c0_i32 = arith.constant 0 : i32
    %c0_i32_0 = arith.constant 0 : i32
    %c0_i32_1 = arith.constant 0 : i32
    return %c0_i32, %c0_i32_0 : i32, i32
  }
  func.func @transform_14(%arg0: i32) -> (i32, i32) {
    %c0_i32 = arith.constant 0 : i32
    %c0_i32_0 = arith.constant 0 : i32
    %c0_i32_1 = arith.constant 0 : i32
    return %c0_i32, %c0_i32_0 : i32, i32
  }
  func.func @transform_15(%arg0: i32) -> (i32, i32) {
    %c0_i32 = arith.constant 0 : i32
    %c0_i32_0 = arith.constant 0 : i32
    return %c0_i32, %arg0 : i32, i32
  }
}

</mosaic_0001>

<bundles_post_ra>
// kernel: _asa_impl.1
= control target key start
LH: loop header
LB: loop body
LE: loop exit
PB: predicated region body
PF: predicated region fallthrough
CT: control target
= control target key end

     0   :  { %20 = vsyncpa [#allocation3], 0  ;;  %s1738_s18 = smov [#allocation2]   ;;  %s2318_s0 = inlined_call_operand.vmem [shape: f32[16,512], index: 0, kind: input, shape index: {}]   ;;  %s2319_s1 = inlined_call_operand.hbm [shape: f32[512,4], index: 1, kind: input, shape index: {}]   ;;  %s2320_s2 = inlined_call_operand.vmem [shape: f32[4,512], index: 2, kind: input, shape index: {}]   ;;  %s2321_s3 = inlined_call_operand.vmem [shape: bf16[16,48], index: 3, kind: input, shape index: {}]   ;;  %s2322_s4 = inlined_call_operand.vmem [shape: bf16[16,48], index: 4, kind: input, shape index: {}]   ;;  %s2323_s5 = inlined_call_operand.vmem [shape: bf16[16,32], index: 5, kind: input, shape index: {}]   ;;  %s2324_s6 = inlined_call_operand.vmem [shape: bf16[16,16], index: 6, kind: input, shape index: {}]   ;;  %s2325_s7 = inlined_call_operand.vmem [shape: bf16[16,16], index: 7, kind: input, shape index: {}]   ;;  %s2326_s8 = inlined_call_operand.vmem [shape: bf16[16,16], index: 8, kind: input, shape index: {}]   ;;  %s2327_s9 = inlined_call_operand.vmem [shape: f32[16,1], index: 9, kind: input, shape index: {}]   ;;  %s2328_s10 = inlined_call_operand.vmem [shape: f32[16,1], index: 10, kind: input, shape index: {}]   ;;  %s2329_s11 = inlined_call_operand.vmem [shape: f32[16,1], index: 11, kind: input, shape index: {}]   ;;  %s2330_s12 = inlined_call_operand.vmem [shape: f32[16,1], index: 12, kind: input, shape index: {}]   ;;  %s2331_s13 = inlined_call_operand.vmem [shape: f32[16,1], index: 13, kind: input, shape index: {}]   ;;  %s2332_s14 = inlined_call_operand.vmem [shape: f32[16,1], index: 14, kind: input, shape index: {}]   ;;  %s2333_s15 = inlined_call_operand.vmem [shape: f32[16,512], index: 15, kind: output, shape index: {}]  }
   0x1   :  { %s28_s19 = sshll.u32 %s1738_s18, 4  ;;  %s1714_s22 = scalar_lea.hbm %s2319_s1, 8192  ;;  %s29_s19 = int_to_ptr.vmem [resolvable:$true] %s28_s19 }
   0x2   :  { %p1715_p0 = scmp.ne.s32.totalorder %s2319_s1, %s1714_s22  ;;  %p1718_p1 = scmp.lt.u32.totalorder %s1714_s22, %s2319_s1 }
   0x4   :  { %p1720_p2 = pnand %p1718_p1, %p1715_p0 }
   0x6   :  { %1723 = shalt.err (!%p1720_p2)
}
   0x7   :  { %s1724_s27 = scalar_lea.vmem %s29_s19, 8192  ;;  %p1729_p4 = scmp.lt.s32.totalorder %s29_s19, %s29_s19 }
   0x8   :  { %p1725_p3 = scmp.ne.s32.totalorder %s29_s19, %s1724_s27  ;;  %p1730_p5 = scmp.lt.s32.totalorder %s1724_s27, %s1724_s27 }
   0xa   :  { %p1731_p6 = por %p1730_p5, %p1729_p4 }
   0xc   :  { %p1732_p7 = pnand %p1731_p6, %p1725_p3 }
   0xe   :  { %1735 = shalt.err (!%p1732_p7)
}
   0xf   :  { %s1739_s28 = smov 128   ;;  %s1740_s29 = smov 8  }
  0x10   :  { %34 = dma.hbm_to_vmem [thread:$0]  %s2319_s1, 8192, %s29_s19, [#allocation3], %s1739_s28, %s1739_s28, %s1740_s29  }
  0x11   :  { %1736 = dma.done.wait [#allocation3], 8192  }
  0x12   :  { %1737 = vsyncadd [#allocation3], 4294959104  ;;  %v150_v0 = vld [vmem:[#allocation2 + $0x80] sm:$0xff]  ;;  %v151_v1 = vld [vmem:[#allocation2 + $0x88] sm:$0xff]  ;;  %vm1742_vm0 = vmmov 0   ;;  %s1744_s22 = smov 1  }
  0x13   :  { %v182_v2 = vld [vmem:[#allocation2 + $0x180] sm:$0xff]  ;;  %v1540_v3 = vpack.c.bf16 %v151_v1, %v150_v0  ;;  %v183_v4 = vld [vmem:[#allocation2 + $0x188] sm:$0xff]  ;;  %v152_v11 = vld [vmem:[#allocation2 + $0x90] sm:$0xff]  ;;  %s1745_s23 = smov 127   ;;  %vm348_vm1 = vcmask 31744   ;;  %vm398_vm2 = vcmask 130048  }
  0x14   :  { %v134_v5 = vld [vmem:[#allocation2] sm:$0xff]  ;;  %v135_v6 = vld [vmem:[#allocation2 + $0x8] sm:$0xff]  ;;  %v1572_v7 = vpack.c.bf16 %v183_v4, %v182_v2  ;;  %v153_v13 = vld [vmem:[#allocation2 + $0x98] sm:$0xff]  ;;  %vm599_vm4 = vcmask 1043456  }
  0x15   :  { %v1542_v8 = vpack.c.bf16 %v135_v6, %v134_v5  ;;  %v166_v9 = vld [vmem:[#allocation2 + $0x100] sm:$0xff]  ;;  %v167_v10 = vld [vmem:[#allocation2 + $0x108] sm:$0xff]  ;;  %1541 = vmatprep.subr.bf16.mxu0 %v1540_v3  ;;  %v184_v14 = vld [vmem:[#allocation2 + $0x190] sm:$0xff]  ;;  %v1544_v16 = vpack.c.bf16 %v153_v13, %v152_v11 }
  0x16   :  { %v1574_v12 = vpack.c.bf16 %v167_v10, %v166_v9  ;;  %v185_v15 = vld [vmem:[#allocation2 + $0x198] sm:$0xff]  ;;  %1573 = vmatprep.subr.bf16.mxu1 %v1572_v7  ;;  %v136_v18 = vld [vmem:[#allocation2 + $0x10] sm:$0xff]  ;;  %v154_v23 = vld [vmem:[#allocation2 + $0xa0] sm:$0xff] }
  0x17   :  { %1543 = vmatpush3.bf16.msra.mxu0 %v1542_v8  ;;  %v1576_v17 = vpack.c.bf16 %v185_v15, %v184_v14  ;;  %v137_v19 = vld [vmem:[#allocation2 + $0x18] sm:$0xff]  ;;  %v168_v20 = vld [vmem:[#allocation2 + $0x110] sm:$0xff]  ;;  %v155_v24 = vld [vmem:[#allocation2 + $0xa8] sm:$0xff] }
  0x18   :  { %1575 = vmatpush3.bf16.msra.mxu1 %v1574_v12  ;;  %v1546_v21 = vpack.c.bf16 %v137_v19, %v136_v18  ;;  %v169_v22 = vld [vmem:[#allocation2 + $0x118] sm:$0xff]  ;;  %1545 = vmatprep.subr.bf16.mxu0 %v1544_v16  ;;  %v1548_v26 = vpack.c.bf16 %v155_v24, %v154_v23  ;;  %v186_v27 = vld [vmem:[#allocation2 + $0x1a0] sm:$0xff]  ;;  %v187_v28 = vld [vmem:[#allocation2 + $0x1a8] sm:$0xff] }
  0x19   :  { %1577 = vmatprep.subr.bf16.mxu1 %v1576_v17  ;;  %v1578_v25 = vpack.c.bf16 %v169_v22, %v168_v20  ;;  %v138_v29 = vld [vmem:[#allocation2 + $0x20] sm:$0xff]  ;;  %v1580_v30 = vpack.c.bf16 %v187_v28, %v186_v27  ;;  %v139_v31 = vld [vmem:[#allocation2 + $0x28] sm:$0xff]  ;;  %v156_v35 = vld [vmem:[#allocation2 + $0xb0] sm:$0xff] }
  0x1a   :  { %v170_v32 = vld [vmem:[#allocation2 + $0x120] sm:$0xff]  ;;  %v171_v33 = vld [vmem:[#allocation2 + $0x128] sm:$0xff]  ;;  %v1550_v34 = vpack.c.bf16 %v139_v31, %v138_v29  ;;  %v157_v36 = vld [vmem:[#allocation2 + $0xb8] sm:$0xff] }
  0x1b   :  { %1547 = vmatpush3.bf16.msra.mxu0 %v1546_v21  ;;  %v188_v37 = vld [vmem:[#allocation2 + $0x1b0] sm:$0xff]  ;;  %v1582_v38 = vpack.c.bf16 %v171_v33, %v170_v32  ;;  %v1552_v39 = vpack.c.bf16 %v157_v36, %v156_v35  ;;  %v189_v40 = vld [vmem:[#allocation2 + $0x1b8] sm:$0xff]  ;;  %v158_v46 = vld [vmem:[#allocation2 + $0xc0] sm:$0xff] }
  0x1c   :  { %1579 = vmatpush3.bf16.msra.mxu1 %v1578_v25  ;;  %1549 = vmatprep.subr.bf16.mxu0 %v1548_v26  ;;  %v140_v41 = vld [vmem:[#allocation2 + $0x30] sm:$0xff]  ;;  %v141_v42 = vld [vmem:[#allocation2 + $0x38] sm:$0xff]  ;;  %v1584_v43 = vpack.c.bf16 %v189_v40, %v188_v37  ;;  %v159_v47 = vld [vmem:[#allocation2 + $0xc8] sm:$0xff]  ;;  %v1741_v40 = vmov 0.0  }
  0x1d   :  { %1581 = vmatprep.subr.bf16.mxu1 %v1580_v30  ;;  %v172_v44 = vld [vmem:[#allocation2 + $0x130] sm:$0xff]  ;;  %v173_v45 = vld [vmem:[#allocation2 + $0x138] sm:$0xff]  ;;  %v190_v48 = vld [vmem:[#allocation2 + $0x1c0] sm:$0xff]  ;;  %v1554_v50 = vpack.c.bf16 %v141_v42, %v140_v41  ;;  %v1556_v52 = vpack.c.bf16 %v159_v47, %v158_v46  ;;  %v1743_v42 = vmov 0  }
  0x1e   :  { %v191_v49 = vld [vmem:[#allocation2 + $0x1c8] sm:$0xff]  ;;  %v1586_v51 = vpack.c.bf16 %v173_v45, %v172_v44  ;;  %v142_v53 = vld [vmem:[#allocation2 + $0x40] sm:$0xff]  ;;  %v160_v58 = vld [vmem:[#allocation2 + $0xd0] sm:$0xff]  ;;  %1612 = vset.pattern.permute.xlu0 %v1743_v42  ;;  %1613 = vset.pattern.permute.xlu1 %v1743_v42 }
  0x1f   :  { %1551 = vmatpush3.bf16.msra.mxu0 %v1550_v34  ;;  %v143_v54 = vld [vmem:[#allocation2 + $0x48] sm:$0xff]  ;;  %v174_v55 = vld [vmem:[#allocation2 + $0x140] sm:$0xff]  ;;  %v1588_v56 = vpack.c.bf16 %v191_v49, %v190_v48  ;;  %v161_v59 = vld [vmem:[#allocation2 + $0xd8] sm:$0xff] }
  0x20   :  { %1583 = vmatpush3.bf16.msra.mxu1 %v1582_v38  ;;  %1553 = vmatprep.subr.bf16.mxu0 %v1552_v39  ;;  %v175_v57 = vld [vmem:[#allocation2 + $0x148] sm:$0xff]  ;;  %v192_v60 = vld [vmem:[#allocation2 + $0x1d0] sm:$0xff]  ;;  %v193_v61 = vld [vmem:[#allocation2 + $0x1d8] sm:$0xff]  ;;  %v1558_v62 = vpack.c.bf16 %v143_v54, %v142_v53  ;;  %v1560_v0 = vpack.c.bf16 %v161_v59, %v160_v58 }
  0x21   :  { %1585 = vmatprep.subr.bf16.mxu1 %v1584_v43  ;;  %v1590_v63 = vpack.c.bf16 %v175_v57, %v174_v55  ;;  %v144_v1 = vld [vmem:[#allocation2 + $0x50] sm:$0xff]  ;;  %v145_v2 = vld [vmem:[#allocation2 + $0x58] sm:$0xff]  ;;  %v1592_v4 = vpack.c.bf16 %v193_v61, %v192_v60  ;;  %v162_v6 = vld [vmem:[#allocation2 + $0xe0] sm:$0xff] }
  0x22   :  { %v176_v3 = vld [vmem:[#allocation2 + $0x150] sm:$0xff]  ;;  %v177_v5 = vld [vmem:[#allocation2 + $0x158] sm:$0xff]  ;;  %v163_v7 = vld [vmem:[#allocation2 + $0xe8] sm:$0xff]  ;;  %v1562_v10 = vpack.c.bf16 %v145_v2, %v144_v1 }
  0x23   :  { %1555 = vmatpush3.bf16.msra.mxu0 %v1554_v50  ;;  %v194_v8 = vld [vmem:[#allocation2 + $0x1e0] sm:$0xff]  ;;  %v195_v9 = vld [vmem:[#allocation2 + $0x1e8] sm:$0xff]  ;;  %v1594_v14 = vpack.c.bf16 %v177_v5, %v176_v3  ;;  %v1564_v15 = vpack.c.bf16 %v163_v7, %v162_v6  ;;  %v1846_v18 = vld [vmem:[%s2318_s0 + $0x18] sm:$0xff] }
  0x24   :  { %1587 = vmatpush3.bf16.msra.mxu1 %v1586_v51  ;;  %1557 = vmatprep.subr.bf16.mxu0 %v1556_v52  ;;  %v146_v11 = vld [vmem:[#allocation2 + $0x60] sm:$0xff]  ;;  %v147_v12 = vld [vmem:[#allocation2 + $0x68] sm:$0xff]  ;;  %v1596_v19 = vpack.c.bf16 %v195_v9, %v194_v8  ;;  %v164_v20 = vld [vmem:[#allocation2 + $0xf0] sm:$0xff] }
  0x25   :  { %1589 = vmatprep.subr.bf16.mxu1 %v1588_v56  ;;  %v178_v13 = vld [vmem:[#allocation2 + $0x160] sm:$0xff]  ;;  %v179_v16 = vld [vmem:[#allocation2 + $0x168] sm:$0xff]  ;;  %v165_v21 = vld [vmem:[#allocation2 + $0xf8] sm:$0xff]  ;;  %337 = vmatprep.mubr.f32.mxu1 %v1846_v18  ;;  %v1566_v26 = vpack.c.bf16 %v147_v12, %v146_v11 }
  0x26   :  { %v1841_v17 = vld [vmem:[%s2318_s0 + $0x8] sm:$0xff]  ;;  %v196_v22 = vld [vmem:[#allocation2 + $0x1f0] sm:$0xff]  ;;  %v197_v23 = vld [vmem:[#allocation2 + $0x1f8] sm:$0xff]  ;;  %v1598_v29 = vpack.c.bf16 %v179_v16, %v178_v13  ;;  %v1568_v30 = vpack.c.bf16 %v165_v21, %v164_v20 }
  0x27   :  { %1559 = vmatpush3.bf16.msra.mxu0 %v1558_v62  ;;  %262 = vmatprep.mubr.f32.mxu0 %v1841_v17  ;;  %v148_v24 = vld [vmem:[#allocation2 + $0x70] sm:$0xff]  ;;  %v149_v25 = vld [vmem:[#allocation2 + $0x78] sm:$0xff]  ;;  %v1600_v31 = vpack.c.bf16 %v197_v23, %v196_v22  ;;  %v1853_v34 = vld [vmem:[%s2318_s0] sm:$0xff] }
  0x28   :  { %1591 = vmatpush3.bf16.msra.mxu1 %v1590_v63  ;;  %1561 = vmatprep.subr.bf16.mxu0 %v1560_v0  ;;  %v180_v27 = vld [vmem:[#allocation2 + $0x170] sm:$0xff]  ;;  %v181_v28 = vld [vmem:[#allocation2 + $0x178] sm:$0xff]  ;;  %v1570_v32 = vpack.c.bf16 %v149_v25, %v148_v24  ;;  %v1863_v36 = vld [vmem:[%s2318_s0 + $0x28] sm:$0xff] }
  0x29   :  { %1593 = vmatprep.subr.bf16.mxu1 %v1592_v4  ;;  %v1602_v33 = vpack.c.bf16 %v181_v28, %v180_v27  ;;  %v1858_v35 = vld [vmem:[%s2318_s0 + $0x10] sm:$0xff]  ;;  %v1868_v37 = vld [vmem:[%s2318_s0 + $0x38] sm:$0xff]  ;;  %v1876_v38 = vld [vmem:[%s2318_s0 + $0x20] sm:$0xff] }
  0x2a   :  { %v1882_v39 = vld [vmem:[%s2318_s0 + $0x30] sm:$0xff]  ;;  %v381_v41 = vld [vmem:[%s2330_s12] sm:$0xff]  ;;  %v382_v43 = vld [vmem:[%s2330_s12 + $0x8] sm:$0xff]  ;;  %v1614_v45 = vpack.i.bf16 %v1876_v38, %v1853_v34 }
  0x2b   :  { %1563 = vmatpush3.bf16.msra.mxu0 %v1562_v10  ;;  %385 = vperm.xlu0 %1612, %v381_v41   ;;  %v514_v44 = vld [vmem:[%s2332_s14] sm:$0xff]  ;;  %v1624_v46 = vpack.i.bf16 %v1882_v39, %v1858_v35  ;;  %v1629_v41 = vpack.i.bf16 %v1868_v37, %v1846_v18 }
  0x2c   :  { %1595 = vmatpush3.bf16.msra.mxu1 %v1594_v14  ;;  %1565 = vmatprep.subr.bf16.mxu0 %v1564_v15  ;;  %v858_v47 = vld [vmem:[%s2327_s9] sm:$0xff] }
  0x2d   :  { %1597 = vmatprep.subr.bf16.mxu1 %v1596_v19 }
  0x2f   :  { %1567 = vmatpush3.bf16.msra.mxu0 %v1566_v26  ;;  %390 = vperm.xlu0 %1612, %v382_v43   ;;  %v859_v43 = vld [vmem:[%s2327_s9 + $0x8] sm:$0xff] }
  0x30   :  { %1599 = vmatpush3.bf16.msra.mxu1 %v1598_v29  ;;  %1569 = vmatprep.subr.bf16.mxu0 %v1568_v30  ;;  %v1694_v29 = vld [vmem:[%s2324_s6] sm:$0xff]  }
  0x31   :  { %1601 = vmatprep.subr.bf16.mxu1 %v1600_v31  ;;  %v448_v30 = vld [vmem:[%s2331_s13] sm:$0xff]  ;;  %v449_v31 = vld [vmem:[%s2331_s13 + $0x8] sm:$0xff] }
  0x32   :  { %452 = vperm.xlu1 %1613, %v448_v30  }
  0x33   :  { %1571 = vmatpush3.bf16.msra.mxu0 %v1570_v32  ;;  %518 = vperm.xlu0 %1612, %v514_v44   ;;  %v515_v32 = vld [vmem:[%s2332_s14 + $0x8] sm:$0xff] }
  0x34   :  { %1603 = vmatpush3.bf16.msra.mxu1 %v1602_v33  ;;  %1522 = vmatprep.subr.bf16.mxu0 %v1741_v40  ;;  %v1619_v33 = vpack.i.bf16 %v1863_v36, %v1841_v17 }
  0x35   :  { %1528 = vmatprep.subr.bf16.mxu1 %v1741_v40 }
  0x36   :  { %263 = vmatmul.mubr.f32.vlgmr.msra.gmra.mrb[0].mxu0 %v1853_v34  ;;  %457 = vperm.xlu1 %1613, %v449_v31  }
  0x37   :  { %338 = vmatmul.mubr.f32.vlgmr.msra.gmra.mrb[0].mxu1 %v1858_v35  ;;  %267 = vmatprep.mubr.f32.mxu0 %v1863_v36 }
  0x38   :  { %342 = vmatprep.mubr.f32.mxu1 %v1868_v37  ;;  %1615 = vrot.lane.b32.xlu0 %v1614_v45, %s1744_s22 }
  0x3a   :  { %268 = vmatmul.mubr.f32.gmra.mrb[2].mxu0 %v1876_v38  ;;  %523 = vperm.xlu1 %1613, %v515_v32  }
  0x3b   :  { %343 = vmatmul.mubr.f32.gmra.mrb[2].mxu1 %v1882_v39  ;;  %1524 = vmatprep.mubr.msk.bf16.mxu0 %vm1742_vm0, %v1741_v40 }
  0x3c   :  { %1530 = vmatprep.mubr.msk.bf16.mxu1 %vm1742_vm0, %v1741_v40  ;;  %1625 = vrot.lane.b32.xlu0 %v1624_v46, %s1744_s22 }
  0x3e   :  { %1620 = vrot.lane.b32.xlu1 %v1619_v33, %s1744_s22 }
  0x40   :  { %1635 = vrot.lane.b32.xlu0 %v1614_v45, %s1745_s23 }
  0x42   :  { %1630 = vrot.lane.b32.xlu1 %v1629_v41, %s1744_s22 }
  0x44   :  { %1645 = vrot.lane.b32.xlu0 %v1624_v46, %s1745_s23 }
  0x46   :  { %1640 = vrot.lane.b32.xlu1 %v1619_v33, %s1745_s23 }
  0x48   :  { %862 = vperm.xlu0 %1612, %v858_v47  }
  0x4a   :  { %1650 = vrot.lane.b32.xlu1 %v1629_v41, %s1745_s23  ;;  %v587_v41 = vld [vmem:[%s2320_s2] sm:$0xff] }
  0x4e   :  { %867 = vperm.xlu1 %1613, %v859_v43   ;;  %v591_v43 = vcombine.high %v587_v41, %v587_v41 }
  0xaa   :  { %v386_v44 = vpop.permute.xlu0 %385 }
 0x109   :  { %v1472_v48 = vpop.f32.mrb[0].mxu0 }
 0x10a   :  { %v1510_v49 = vpop.f32.mrb[0].mxu1  ;;  %v1473_v50 = vpop.f32.mrb[1].mxu0 }
 0x10b   :  { %v1474_v51 = vadd.f32 %v1473_v50, %v1472_v48  ;;  %v1511_v52 = vpop.f32.mrb[1].mxu1  ;;  %v391_v48 = vpop.permute.xlu0 %390 }
 0x10c   :  { %v1512_v53 = vadd.f32 %v1511_v52, %v1510_v49 }
 0x10d   :  { %v1475_v54 = vpop.f32.mrb[2].mxu0 }
 0x10e   :  { %v340_v55 = vadd.f32 %v1512_v53, %v1474_v51  ;;  %v1513_v56 = vpop.f32.mrb[2].mxu1  ;;  %v1476_v57 = vpop.f32.mrb[3].mxu0 }
 0x10f   :  { %v1477_v58 = vadd.f32 %v1476_v57, %v1475_v54  ;;  %v1514_v59 = vpop.f32.mrb[3].mxu1  ;;  %v453_v57 = vpop.permute.xlu1 %452 }
 0x110   :  { %v1515_v60 = vadd.f32 %v1514_v59, %v1513_v56  ;;  %v349_v62 = vsel %vm348_vm1, %v340_v55, 0.0  ;;  %v1948_v56 = vpop.permute.xlu0 %518 }
 0x112   :  { %v345_v61 = vadd.f32 %v1515_v60, %v1477_v58  ;;  %v73_v60 = vlaneseq }
 0x113   :  { %v458_v59 = vpop.permute.xlu1 %457 }
 0x114   :  { %v350_v63 = vsel %vm348_vm1, %v345_v61, 0.0  ;;  %v1616_v58 = vpop.permute.xlu0 %1615 }
 0x115   :  { %v351_v0 = vadd.f32 %v350_v63, %v349_v62  ;;  %v1954_v63 = vand.u32 127, %v73_v60 }
 0x117   :  { %v352_v1 = vrot.slane %v351_v0, 4  ;;  %vm778_vm3 = vcmp.lt.s32.totalorder %v1954_v63, 1  ;;  %v1987_v30 = vadd.s32 128, %v1954_v63  ;;  %vm1433_vm9 = vcmp.ne.s32.totalorder %v1954_v63, 0 }
 0x118   :  { %v1626_v62 = vpop.permute.xlu0 %1625  ;;  %vm819_vm11 = vcmp.lt.s32.totalorder %v1954_v63, 127  ;;  %vm2034_vm12 = vmpackc.low %vm1433_vm9, %vm1433_vm9 }
 0x119   :  { %v353_v2 = vadd.f32 %v352_v1, %v351_v0  ;;  %v1628_v0 = vunpack.i.h.bf16 %v1626_v62  ;;  %v1627_v1 = vunpack.i.l.bf16 %v1626_v62 }
 0x11b   :  { %v354_v3 = vrot.slane %v353_v2, 2 }
 0x11d   :  { %v355_v4 = vadd.f32 %v354_v3, %v353_v2 }
 0x11f   :  { %v356_v5 = vrot.slane %v355_v4, 1 }
 0x121   :  { %v357_v6 = vadd.f32 %v356_v5, %v355_v4  ;;  %v1618_v5 = vunpack.i.h.bf16 %v1616_v58 }
 0x123   :  { %v359_v7 = vmul.f32 0.0625, %v357_v6  ;;  %v1617_v6 = vunpack.i.l.bf16 %v1616_v58 }
 0x125   :  { %v360_v8 = vsub.f32 %v340_v55, %v359_v7  ;;  %v361_v9 = vsub.f32 %v345_v61, %v359_v7  ;;  %v1695_v55 = vld [vmem:[%s2325_s7] sm:$0xff]   ;;  %v1952_v61 = vpop.permute.xlu1 %523 }
 0x127   :  { %v362_v10 = vmul.f32 %v360_v8, %v360_v8  ;;  %v363_v11 = vmul.f32 %v361_v9, %v361_v9 }
 0x129   :  { %v364_v12 = vsel %vm348_vm1, %v362_v10, 0.0  ;;  %v365_v13 = vsel %vm348_vm1, %v363_v11, 0.0  ;;  %v1621_v2 = vpop.permute.xlu1 %1620 }
 0x12a   :  { %v366_v14 = vadd.f32 %v365_v13, %v364_v12  ;;  %v1623_v3 = vunpack.i.h.bf16 %v1621_v2  ;;  %v1622_v4 = vunpack.i.l.bf16 %v1621_v2  ;;  %v76_v2 = vadd.s32 256, %v1954_v63 }
 0x12c   :  { %v367_v15 = vrot.slane %v366_v14, 4  ;;  %v1959_v7 = vsel %vm778_vm3, %v1622_v4, %v1627_v1 }
 0x12d   :  { %v1631_v10 = vpop.permute.xlu1 %1630 }
 0x12e   :  { %v368_v16 = vadd.f32 %v367_v15, %v366_v14  ;;  %v1633_v11 = vunpack.i.h.bf16 %v1631_v10  ;;  %v1632_v12 = vunpack.i.l.bf16 %v1631_v10 }
 0x130   :  { %v369_v19 = vrot.slane %v368_v16, 2  ;;  %v1969_v13 = vsel %vm778_vm3, %v1632_v12, %v1617_v6  ;;  %v1973_v14 = vsel %vm778_vm3, %v1633_v11, %v1618_v5  ;;  %v779_v32 = vsel %vm778_vm3, %v1627_v1, %v1632_v12 }
 0x131   :  { %v1352_v15 = vpack.c.bf16 %v1973_v14, %v1969_v13  ;;  %v780_v33 = vsel %vm778_vm3, %v1628_v0, %v1633_v11 }
 0x132   :  { %v370_v20 = vadd.f32 %v369_v19, %v368_v16 }
 0x134   :  { %v371_v21 = vrot.slane %v370_v20, 1 }
 0x136   :  { %v372_v22 = vadd.f32 %v371_v21, %v370_v20 }
 0x138   :  { %v373_v23 = vmul.f32 0.0625, %v372_v22 }
 0x13a   :  { %v374_v24 = vadd.f32 1e-05, %v373_v23 }
 0x13c   :  { %1702 = vrsqrt.f32 %v374_v24 }
 0x146   :  { %v1703_v25 = vpop.eup %1702 }
 0x147   :  { %v377_v26 = vmul.f32 %v1703_v25, %v361_v9  ;;  %v376_v27 = vmul.f32 %v1703_v25, %v360_v8  ;;  %v1963_v8 = vsel %vm778_vm3, %v1623_v3, %v1628_v0  ;;  %v1636_v0 = vpop.permute.xlu0 %1635 }
 0x148   :  { %v1373_v9 = vpack.c.bf16 %v1963_v8, %v1959_v7 }
 0x149   :  { %v380_v28 = vpack.c.bf16 %v377_v26, %v376_v27  ;;  %v1696_v27 = vld [vmem:[%s2326_s8] sm:$0xff]  }
 0x14b   :  { %1523 = vmatpush3.bf16.msra.mxu0 %v380_v28  ;;  %v783_v28 = vsel %vm778_vm3, %v1617_v6, %v1622_v4  ;;  %v1641_v4 = vpop.permute.xlu1 %1640  ;;  %v96_v6 = vand.u32 127, %v76_v2 }
 0x14c   :  { %1534 = vmatprep.subr.bf16.mxu0 %v1741_v40 }
 0x14d   :  { %vm2029_vm10 = vcmp.ne.s32.totalorder %v96_v6, 0  ;;  %vm2093_vm9 = vcmp.ne.s32.totalorder %v96_v6, 127 }
 0x14e   :  { %1525 = vmatmul.mubr.msk.bf16.vlgmr.msra.gmra.mrb[4].mxu0 %vm398_vm2, %v1694_v29  ;;  %v784_v29 = vsel %vm778_vm3, %v1618_v5, %v1623_v3  ;;  %vm2334_vm13 = vmpackc.low %vm2029_vm10, %vm2029_vm10 }
 0x14f   :  { %1536 = vmatprep.mubr.msk.bf16.mxu0 %vm1742_vm0, %v1741_v40  ;;  %v1347_v31 = vpack.c.bf16 %v784_v29, %v783_v28  ;;  %v1651_v11 = vpop.permute.xlu1 %1650  ;;  %v851_v28 = vpack.c.bf16 %v1863_v36, %v1841_v17  ;;  %v853_v29 = vpack.c.bf16 %v1868_v37, %v1846_v18 }
 0x221   :  { %v436_v45 = vpop.f32.mrb[4].mxu0 }
 0x222   :  { %v437_v46 = vadd.f32 %v436_v45, %v386_v44  ;;  %v1526_v47 = vpop.f32.mrb[5].mxu0  ;;  %v588_v44 = vld [vmem:[%s2320_s2 + $0x8] sm:$0xff]  ;;  %v89_v45 = vand.u32 127, %v1987_v30 }
 0x223   :  { %v439_v49 = vpop.f32.mrb[6].mxu0  ;;  %v592_v47 = vcombine.high %v588_v44, %v588_v44 }
 0x224   :  { %v440_v50 = vadd.f32 %v439_v49, %v391_v48  ;;  %v1527_v51 = vpop.f32.mrb[7].mxu0  ;;  %v443_v52 = vmax.f32 %v437_v46, 0.0  ;;  %v77_v46 = vadd.s32 384, %v1954_v63  ;;  %v1368_v48 = vpack.c.bf16 %v780_v33, %v779_v32 }
 0x225   :  { %vm2001_vm5 = vcmp.ne.s32.totalorder %v89_v45, 0  ;;  %vm2057_vm15 = vcmp.ne.s32.totalorder %v89_v45, 127 }
 0x226   :  { %v444_v53 = vmax.f32 %v440_v50, 0.0  ;;  %v103_v50 = vand.u32 127, %v77_v46  ;;  %vm1346_vm6 = vmpackc.low %vm2001_vm5, %vm2001_vm5  ;;  %vm1200_vm5 = vcmask 261120  }
 0x228   :  { %v447_v54 = vpack.c.bf16 %v444_v53, %v443_v52  ;;  %vm2013_vm7 = vcmp.ne.s32.totalorder %v103_v50, 0  ;;  %vm2049_vm14 = vcmp.ne.s32.totalorder %v103_v50, 127 }
 0x229   :  { %vm1367_vm8 = vmpackc.low %vm2013_vm7, %vm2013_vm7 }
 0x22a   :  { %1529 = vmatpush3.bf16.msra.mxu1 %v447_v54  ;;  %vm1377_vm0 = vmpackc.low %vm2049_vm14, %vm2049_vm14 }
 0x22b   :  { %1335 = vmatprep.subr.msk.mxu1 %vm599_vm4, %v591_v43  ;;  %v852_v43 = vpack.c.bf16 %v1882_v39, %v1858_v35 }
 0x22d   :  { %1531 = vmatmul.mubr.msk.bf16.vlgmr.msra.gmra.mrb[4].mxu1 %vm398_vm2, %v1695_v55 }
 0x22e   :  { %672 = vmatprep.mubr.f32.mxu1 %v1741_v40  ;;  %1336 = vmatpush1.msk.msra.mxu1 %vm599_vm4, %v587_v41  ;;  %v850_v41 = vpack.c.bf16 %v1876_v38, %v1853_v34 }
 0x22f   :  { %1348 = vmatprep.subr.msk.bf16.mxu1 %vm1346_vm6, %v1347_v31 }
 0x300   :  { %v502_v16 = vpop.f32.mrb[4].mxu1 }
 0x301   :  { %v503_v19 = vadd.f32 %v502_v16, %v453_v57  ;;  %v1532_v20 = vpop.f32.mrb[5].mxu1  ;;  %v1637_v16 = vunpack.i.l.bf16 %v1636_v0 }
 0x302   :  { %v505_v21 = vpop.f32.mrb[6].mxu1  ;;  %v1652_v20 = vunpack.i.l.bf16 %v1651_v11 }
 0x303   :  { %v506_v22 = vadd.f32 %v505_v21, %v458_v59  ;;  %v1533_v23 = vpop.f32.mrb[7].mxu1  ;;  %v509_v24 = vmax.f32 %v503_v19, 0.0  ;;  %v1642_v19 = vunpack.i.l.bf16 %v1641_v4  ;;  %v1638_v21 = vunpack.i.h.bf16 %v1636_v0 }
 0x304   :  { %v1653_v23 = vunpack.i.h.bf16 %v1651_v11  ;;  %v826_v31 = vsel %vm819_vm11, %v1652_v20, %v1637_v16 }
 0x305   :  { %v510_v25 = vmax.f32 %v506_v22, 0.0  ;;  %v1643_v22 = vunpack.i.h.bf16 %v1641_v4 }
 0x306   :  { %v827_v33 = vsel %vm819_vm11, %v1653_v23, %v1638_v21 }
 0x307   :  { %v513_v26 = vpack.c.bf16 %v510_v25, %v509_v24 }
 0x309   :  { %1535 = vmatpush3.bf16.msra.mxu0 %v513_v26 }
 0x30a   :  { %1339 = vmatprep.subr.msk.mxu0 %vm599_vm4, %v592_v47 }
 0x30c   :  { %1537 = vmatmul.mubr.msk.bf16.vlgmr.msra.gmra.mrb[8].mxu0 %vm398_vm2, %v1696_v27  ;;  %vm1435_vm2 = vcmp.ne.s32.totalorder %v1954_v63, 127 }
 0x30d   :  { %749 = vmatprep.mubr.f32.mxu0 %v1741_v40  ;;  %1340 = vmatpush1.msk.msra.mxu0 %vm599_vm4, %v588_v44  ;;  %vm1356_vm4 = vmpackc.low %vm2057_vm15, %vm2057_vm15 }
 0x30e   :  { %1369 = vmatprep.subr.msk.bf16.mxu0 %vm1367_vm8, %v1368_v48  ;;  %v1699_v48 = vld [vmem:[%s2321_s3] sm:$0xff]  }
 0x3df   :  { %v568_v52 = vpop.f32.mrb[8].mxu0 }
 0x3e0   :  { %v569_v53 = vadd.f32 %v568_v52, %v1948_v56  ;;  %v1538_v54 = vpop.f32.mrb[9].mxu0  ;;  %v1646_v56 = vpop.permute.xlu0 %1645 }
 0x3e1   :  { %v571_v55 = vpop.f32.mrb[10].mxu0  ;;  %v1647_v10 = vunpack.i.l.bf16 %v1646_v56 }
 0x3e2   :  { %v1333_v57 = vmul.f32 -1.442695, %v569_v53  ;;  %v572_v58 = vadd.f32 %v571_v55, %v1952_v61  ;;  %v1539_v59 = vpop.f32.mrb[11].mxu0  ;;  %v1648_v61 = vunpack.i.h.bf16 %v1646_v56 }
 0x3e3   :  { %v822_v25 = vsel %vm819_vm11, %v1642_v19, %v1647_v10  ;;  %v820_v13 = vsel %vm819_vm11, %v1647_v10, %v1652_v20 }
 0x3e4   :  { %1704 = vpow2.f32 %v1333_v57  ;;  %v1334_v60 = vmul.f32 -1.442695, %v572_v58  ;;  %v823_v27 = vsel %vm819_vm11, %v1643_v22, %v1648_v61  ;;  %v821_v14 = vsel %vm819_vm11, %v1648_v61, %v1653_v23  ;;  %v868_v61 = vpop.permute.xlu1 %867 }
 0x3e5   :  { %v1357_v44 = vpack.c.bf16 %v823_v27, %v822_v25  ;;  %v1383_v45 = vpack.c.bf16 %v821_v14, %v820_v13 }
 0x3e6   :  { %1706 = vpow2.f32 %v1334_v60 }
 0x3ee   :  { %v1705_v62 = vpop.eup %1704 }
 0x3ef   :  { %v581_v1 = vadd.f32 1.0, %v1705_v62 }
 0x3f0   :  { %v1707_v3 = vpop.eup %1706 }
 0x3f1   :  { %1708 = vrcp.f32 %v581_v1  ;;  %v582_v5 = vadd.f32 1.0, %v1707_v3 }
 0x3f3   :  { %1710 = vrcp.f32 %v582_v5 }
 0x3fb   :  { %v1709_v26 = vpop.eup %1708 }
 0x3fc   :  { %1337 = vmatmul.mubr.msk.f32.vlgmr.msra.gmra.mrb[8].mxu1 %vm348_vm1, %v1709_v26  ;;  %1341 = vmatmul.mubr.msk.f32.vlgmr.msra.gmra.mrb[12].mxu0 %vm348_vm1, %v1709_v26 }
 0x3fd   :  { %1353 = vmatpush1.bf16.msk.msra.mxu1 %vm2034_vm12, %v1352_v15  ;;  %1374 = vmatpush1.bf16.msk.msra.mxu0 %vm2334_vm13, %v1373_v9  ;;  %v1711_v7 = vpop.eup %1710  ;;  %v825_v9 = vsel %vm819_vm11, %v1638_v21, %v1643_v22  ;;  %v1378_v15 = vpack.c.bf16 %v827_v33, %v826_v31  ;;  %vm2103_vm13 = vmpackc.low %vm1435_vm2, %vm1435_vm2  ;;  %vm875_vm2 = vcmask 392192  }
 0x3fe   :  { %678 = vmatprep.mubr.f32.mxu1 %v1741_v40  ;;  %755 = vmatprep.mubr.f32.mxu0 %v1741_v40  ;;  %v824_v40 = vsel %vm819_vm11, %v1637_v16, %v1642_v19 }
 0x3ff   :  { %881 = vmatprep.subr.bf16.mxu1 %v851_v28  ;;  %924 = vmatprep.subr.bf16.mxu0 %v853_v29  ;;  %v1362_v47 = vpack.c.bf16 %v825_v9, %v824_v40 }
 0x400   :  { %1338 = vmatmul.mubr.msk.f32.gmra.mrb[10].mxu1 %vm348_vm1, %v1711_v7  ;;  %1342 = vmatmul.mubr.msk.f32.gmra.mrb[14].mxu0 %vm348_vm1, %v1711_v7  ;;  %vm1382_vm1 = vmpackc.low %vm2093_vm9, %vm2093_vm9 }
 0x401   :  { %882 = vmatpush1.bf16.msra.mxu1 %v850_v41  ;;  %925 = vmatpush1.bf16.msra.mxu0 %v852_v43 }
 0x402   :  { %1358 = vmatprep.subr.msk.bf16.mxu1 %vm1356_vm4, %v1357_v44  ;;  %1379 = vmatprep.subr.msk.bf16.mxu0 %vm1377_vm0, %v1378_v15 }
 0x403   :  { %911 = vmatprep.mubr.bf16.mxu1 %v1743_v42  ;;  %954 = vmatprep.mubr.bf16.mxu0 %v1743_v42 }
 0x405   :  { %1363 = vmatpush1.bf16.msk.msra.mxu1 %vm2103_vm13, %v1362_v47  ;;  %1384 = vmatpush1.bf16.msk.msra.mxu0 %vm1382_vm1, %v1383_v45 }
 0x408   :  { %1364 = vmatmul.mubr.msk.bf16.vlgmr.msra.gmra.mrb[12].mxu1 %vm875_vm2, %v1699_v48  ;;  %1385 = vmatmul.mubr.msk.bf16.vlgmr.msra.gmra.mrb[16].mxu0 %vm875_vm2, %v1699_v48 }
 0x409   :  { %1103 = vmatprep.mubr.bf16.mxu1 %v1743_v42  ;;  %1146 = vmatprep.mubr.bf16.mxu0 %v1743_v42 }
 0x4cf   :  { %v674_v50 = vpop.f32.mrb[8].mxu1  ;;  %v751_v52 = vpop.f32.mrb[12].mxu0 }
 0x4d0   :  { %v676_v53 = vpop.f32.mrb[9].mxu1  ;;  %v753_v54 = vpop.f32.mrb[13].mxu0  ;;  %v2137_v58 = vmul.f32 %v674_v50, %v1853_v34  ;;  %v2140_v59 = vmul.f32 %v751_v52, %v1858_v35 }
 0x4d1   :  { %v2149_v2 = vmul.f32 %v676_v53, %v1841_v17  ;;  %v2152_v3 = vmul.f32 %v753_v54, %v1846_v18  ;;  %v863_v18 = vpop.permute.xlu0 %862 }
 0x4d3   :  { %v680_v55 = vpop.f32.mrb[10].mxu1  ;;  %v757_v57 = vpop.f32.mrb[14].mxu0 }
 0x4d4   :  { %v2143_v60 = vmul.f32 %v680_v55, %v1876_v38  ;;  %v2146_v62 = vmul.f32 %v757_v57, %v1882_v39  ;;  %v682_v0 = vpop.f32.mrb[11].mxu1  ;;  %v759_v1 = vpop.f32.mrb[15].mxu0 }
 0x4d5   :  { %v2155_v4 = vmul.f32 %v682_v0, %v1863_v36  ;;  %v2158_v5 = vmul.f32 %v759_v1, %v1868_v37  ;;  %v1051_v0 = vld [vmem:[%s2328_s10] sm:$0xff]  ;;  %v1052_v1 = vld [vmem:[%s2328_s10 + $0x8] sm:$0xff] }
 0x4d6   :  { %v1175_v6 = vpack.c.bf16 %v2143_v60, %v2137_v58  ;;  %v1177_v56 = vpack.c.bf16 %v2146_v62, %v2140_v59 }
 0x4d7   :  { %v1176_v10 = vpack.c.bf16 %v2155_v4, %v2149_v2  ;;  %v1178_v17 = vpack.c.bf16 %v2158_v5, %v2152_v3 }
 0x4db   :  { %v913_v11 = vpop.f32.mrb[12].mxu1  ;;  %v956_v16 = vpop.f32.mrb[16].mxu0 }
 0x4dc   :  { %v914_v19 = vadd.f32 %v913_v11, %v863_v18  ;;  %v957_v20 = vadd.f32 %v956_v16, %v863_v18  ;;  %v915_v21 = vpop.f32.mrb[13].mxu1  ;;  %v958_v22 = vpop.f32.mrb[17].mxu0 }
 0x4dd   :  { %v916_v23 = vadd.f32 %v915_v21, %v863_v18  ;;  %v959_v25 = vadd.f32 %v958_v22, %v863_v18  ;;  %v917_v26 = vpop.f32.mrb[14].mxu1  ;;  %v960_v27 = vpop.f32.mrb[18].mxu0  ;;  %v1183_v18 = vld [vmem:[%s2329_s11] sm:$0xff] }
 0x4de   :  { %v918_v28 = vadd.f32 %v917_v26, %v868_v61  ;;  %v961_v29 = vadd.f32 %v960_v27, %v868_v61  ;;  %v919_v31 = vpop.f32.mrb[15].mxu1  ;;  %v962_v33 = vpop.f32.mrb[19].mxu0  ;;  %v965_v44 = vmax.f32 %v914_v19, 0.0  ;;  %v967_v13 = vmax.f32 %v957_v20, 0.0 }
 0x4df   :  { %v920_v41 = vadd.f32 %v919_v31, %v868_v61  ;;  %v963_v43 = vadd.f32 %v962_v33, %v868_v61  ;;  %v966_v40 = vmax.f32 %v916_v23, 0.0  ;;  %v968_v9 = vmax.f32 %v959_v25, 0.0  ;;  %v1184_v61 = vld [vmem:[%s2329_s11 + $0x8] sm:$0xff] }
 0x4e0   :  { %v969_v14 = vmax.f32 %v918_v28, 0.0  ;;  %v971_v7 = vmax.f32 %v961_v29, 0.0 }
 0x4e1   :  { %v970_v15 = vmax.f32 %v920_v41, 0.0  ;;  %v972_v45 = vmax.f32 %v963_v43, 0.0 }
 0x4e2   :  { %v2168_v47 = vpack.c.bf16 %v969_v14, %v965_v44  ;;  %v2170_v48 = vpack.c.bf16 %v971_v7, %v967_v13  ;;  %v1654_v50 = vpack.i.bf16 %v969_v14, %v965_v44  ;;  %v1659_v52 = vpack.i.bf16 %v971_v7, %v967_v13 }
 0x4e3   :  { %v1674_v53 = vpack.i.bf16 %v970_v15, %v966_v40  ;;  %v1679_v54 = vpack.i.bf16 %v972_v45, %v968_v9  ;;  %v1044_v55 = vpack.c.bf16 %v970_v15, %v966_v40  ;;  %v1046_v57 = vpack.c.bf16 %v972_v45, %v968_v9 }
 0x4e4   :  { %1655 = vrot.lane.b32.xlu0 %v1654_v50, %s1744_s22 }
 0x4e5   :  { %1675 = vrot.lane.b32.xlu1 %v1674_v53, %s1744_s22 }
 0x4e8   :  { %1660 = vrot.lane.b32.xlu0 %v1659_v52, %s1744_s22 }
 0x4e9   :  { %1680 = vrot.lane.b32.xlu1 %v1679_v54, %s1744_s22 }
 0x4ec   :  { %1665 = vrot.lane.b32.xlu0 %v1654_v50, %s1745_s23 }
 0x4ed   :  { %1685 = vrot.lane.b32.xlu1 %v1674_v53, %s1745_s23 }
 0x4f0   :  { %1670 = vrot.lane.b32.xlu0 %v1659_v52, %s1745_s23 }
 0x4f1   :  { %1690 = vrot.lane.b32.xlu1 %v1679_v54, %s1745_s23 }
 0x4f4   :  { %1055 = vperm.xlu0 %1612, %v1051_v0  }
 0x4f5   :  { %1060 = vperm.xlu1 %1613, %v1052_v1  }
 0x4f8   :  { %1187 = vperm.xlu0 %1612, %v1183_v18  }
 0x4f9   :  { %1192 = vperm.xlu1 %1613, %v1184_v61  }
 0x556   :  { %v1656_v11 = vpop.permute.xlu0 %1655 }
 0x557   :  { %v1658_v16 = vunpack.i.h.bf16 %v1656_v11  ;;  %v1657_v19 = vunpack.i.l.bf16 %v1656_v11  ;;  %v1676_v20 = vpop.permute.xlu1 %1675 }
 0x558   :  { %v1678_v21 = vunpack.i.h.bf16 %v1676_v20  ;;  %v1677_v22 = vunpack.i.l.bf16 %v1676_v20 }
 0x55a   :  { %v993_v23 = vsel %vm778_vm3, %v1657_v19, %v1677_v22  ;;  %v994_v25 = vsel %vm778_vm3, %v1658_v16, %v1678_v21  ;;  %v1661_v26 = vpop.permute.xlu0 %1660 }
 0x55b   :  { %v1390_v27 = vpack.c.bf16 %v994_v25, %v993_v23  ;;  %v1663_v28 = vunpack.i.h.bf16 %v1661_v26  ;;  %v1662_v29 = vunpack.i.l.bf16 %v1661_v26  ;;  %v1681_v31 = vpop.permute.xlu1 %1680 }
 0x55c   :  { %v1683_v33 = vunpack.i.h.bf16 %v1681_v31  ;;  %v1682_v41 = vunpack.i.l.bf16 %v1681_v31 }
 0x55d   :  { %v992_v43 = vsel %vm778_vm3, %v1678_v21, %v1663_v28  ;;  %v991_v44 = vsel %vm778_vm3, %v1677_v22, %v1662_v29  ;;  %1391 = vmatprep.subr.msk.bf16.mxu1 %vm1346_vm6, %v1390_v27 }
 0x55e   :  { %v996_v13 = vsel %vm778_vm3, %v1683_v33, %v1658_v16  ;;  %v989_v14 = vsel %vm778_vm3, %v1662_v29, %v1682_v41  ;;  %v990_v7 = vsel %vm778_vm3, %v1663_v28, %v1683_v33  ;;  %v1666_v40 = vpop.permute.xlu0 %1665  ;;  %v995_v9 = vsel %vm778_vm3, %v1682_v41, %v1657_v19  ;;  %vm2351_vm3 = vmpackc.low %vm2029_vm10, %vm2029_vm10  ;;  %v1700_v28 = vld [vmem:[%s2322_s4] sm:$0xff]  }
 0x55f   :  { %v1411_v15 = vpack.c.bf16 %v990_v7, %v989_v14  ;;  %v1686_v45 = vpop.permute.xlu1 %1685  ;;  %v1416_v50 = vpack.c.bf16 %v992_v43, %v991_v44  ;;  %v1395_v52 = vpack.c.bf16 %v996_v13, %v995_v9  ;;  %v1668_v49 = vunpack.i.h.bf16 %v1666_v40  ;;  %v1701_v9 = vld [vmem:[%s2323_s5] sm:$0xff]  }
 0x560   :  { %v1667_v53 = vunpack.i.l.bf16 %v1666_v40  ;;  %v1688_v54 = vunpack.i.h.bf16 %v1686_v45  ;;  %v1687_v0 = vunpack.i.l.bf16 %v1686_v45 }
 0x561   :  { %1412 = vmatprep.subr.msk.bf16.mxu0 %vm1367_vm8, %v1411_v15  ;;  %1396 = vmatpush1.bf16.msk.msra.mxu1 %vm2034_vm12, %v1395_v52 }
 0x562   :  { %v1671_v1 = vpop.permute.xlu0 %1670  ;;  %1417 = vmatpush1.bf16.msk.msra.mxu0 %vm2351_vm3, %v1416_v50  ;;  %1073 = vmatprep.subr.bf16.mxu1 %v1044_v55  ;;  %v1025_v51 = vsel %vm819_vm11, %v1667_v53, %v1687_v0  ;;  %v1026_v24 = vsel %vm819_vm11, %v1668_v49, %v1688_v54 }
 0x563   :  { %v1673_v18 = vunpack.i.h.bf16 %v1671_v1  ;;  %v1672_v61 = vunpack.i.l.bf16 %v1671_v1  ;;  %v1691_v11 = vpop.permute.xlu1 %1690  ;;  %1116 = vmatprep.subr.bf16.mxu0 %v1046_v57  ;;  %v1405_v26 = vpack.c.bf16 %v1026_v24, %v1025_v51 }
 0x564   :  { %v1693_v16 = vunpack.i.h.bf16 %v1691_v11  ;;  %v1692_v19 = vunpack.i.l.bf16 %v1691_v11 }
 0x565   :  { %v1024_v20 = vsel %vm819_vm11, %v1688_v54, %v1673_v18  ;;  %v1023_v12 = vsel %vm819_vm11, %v1687_v0, %v1672_v61  ;;  %1074 = vmatpush1.bf16.msra.mxu1 %v2168_v47 }
 0x566   :  { %v1400_v21 = vpack.c.bf16 %v1024_v20, %v1023_v12  ;;  %v1021_v55 = vsel %vm819_vm11, %v1672_v61, %v1692_v19  ;;  %v1022_v57 = vsel %vm819_vm11, %v1673_v18, %v1693_v16  ;;  %v1027_v22 = vsel %vm819_vm11, %v1692_v19, %v1667_v53  ;;  %1117 = vmatpush1.bf16.msra.mxu0 %v2170_v48 }
 0x567   :  { %v1028_v23 = vsel %vm819_vm11, %v1693_v16, %v1668_v49  ;;  %v1426_v25 = vpack.c.bf16 %v1022_v57, %v1021_v55 }
 0x568   :  { %v1421_v27 = vpack.c.bf16 %v1028_v23, %v1027_v22  ;;  %1401 = vmatprep.subr.msk.bf16.mxu1 %vm1356_vm4, %v1400_v21 }
 0x569   :  { %1406 = vmatpush1.bf16.msk.msra.mxu1 %vm2103_vm13, %v1405_v26 }
 0x56a   :  { %1422 = vmatprep.subr.msk.bf16.mxu0 %vm1377_vm0, %v1421_v27  ;;  %1204 = vmatprep.subr.bf16.mxu1 %v1176_v10 }
 0x56b   :  { %1427 = vmatpush1.bf16.msk.msra.mxu0 %vm1382_vm1, %v1426_v25 }
 0x56c   :  { %1247 = vmatprep.subr.bf16.mxu0 %v1178_v17  ;;  %1407 = vmatmul.mubr.msk.bf16.vlgmr.msra.gmra.mrb[16].mxu1 %vm875_vm2, %v1700_v28 }
 0x56d   :  { %1205 = vmatpush1.bf16.msra.mxu1 %v1175_v6  ;;  %1236 = vmatprep.mubr.bf16.mxu1 %v1743_v42 }
 0x56e   :  { %1428 = vmatmul.mubr.msk.bf16.vlgmr.msra.gmra.mrb[20].mxu0 %vm875_vm2, %v1700_v28 }
 0x56f   :  { %1248 = vmatpush1.bf16.msra.mxu0 %v1177_v56  ;;  %1279 = vmatprep.mubr.bf16.mxu0 %v1743_v42 }
 0x573   :  { %v1056_v63 = vpop.permute.xlu0 %1055 }
 0x574   :  { %v1061_v30 = vpop.permute.xlu1 %1060 }
 0x577   :  { %v1188_v15 = vpop.permute.xlu0 %1187 }
 0x578   :  { %v1193_v45 = vpop.permute.xlu1 %1192 }
 0x63f   :  { %v1105_v32 = vpop.f32.mrb[16].mxu1 }
 0x640   :  { %v1106_v8 = vadd.f32 %v1105_v32, %v1056_v63  ;;  %v1107_v46 = vpop.f32.mrb[17].mxu1 }
 0x641   :  { %v1148_v2 = vpop.f32.mrb[20].mxu0  ;;  %v1108_v3 = vadd.f32 %v1107_v46, %v1056_v63  ;;  %v1109_v5 = vpop.f32.mrb[18].mxu1 }
 0x642   :  { %v1149_v4 = vadd.f32 %v1148_v2, %v1056_v63  ;;  %v1150_v10 = vpop.f32.mrb[21].mxu0  ;;  %v1110_v58 = vadd.f32 %v1109_v5, %v1061_v30  ;;  %v1111_v6 = vpop.f32.mrb[19].mxu1  ;;  %v1157_v47 = vmax.f32 %v1106_v8, 0.0  ;;  %v1712_v2 = vld [vmem:[%s2318_s0 + $0x8] sm:$0xff] }
 0x643   :  { %v1151_v60 = vadd.f32 %v1150_v10, %v1056_v63  ;;  %v1152_v17 = vpop.f32.mrb[22].mxu0  ;;  %v1112_v59 = vadd.f32 %v1111_v6, %v1061_v30  ;;  %v1158_v29 = vmax.f32 %v1108_v3, 0.0 }
 0x644   :  { %v1153_v62 = vadd.f32 %v1152_v17, %v1061_v30  ;;  %v1154_v56 = vpop.f32.mrb[23].mxu0  ;;  %v1161_v48 = vmax.f32 %v1110_v58, 0.0  ;;  %v1159_v31 = vmax.f32 %v1149_v4, 0.0 }
 0x645   :  { %v1155_v42 = vadd.f32 %v1154_v56, %v1061_v30  ;;  %v1162_v33 = vmax.f32 %v1112_v59, 0.0  ;;  %v1160_v44 = vmax.f32 %v1151_v60, 0.0 }
 0x646   :  { %v1163_v41 = vmax.f32 %v1153_v62, 0.0  ;;  %v1179_v43 = vpack.c.bf16 %v1161_v48, %v1157_v47 }
 0x647   :  { %v1164_v13 = vmax.f32 %v1155_v42, 0.0  ;;  %v1180_v14 = vpack.c.bf16 %v1162_v33, %v1158_v29 }
 0x648   :  { %v1181_v7 = vpack.c.bf16 %v1163_v41, %v1159_v31 }
 0x649   :  { %v1182_v40 = vpack.c.bf16 %v1164_v13, %v1160_v44  ;;  %1206 = vmatprep.subr.bf16.mxu1 %v1180_v14 }
 0x64a   :  { %1207 = vmatpush1.bf16.msra.mxu1 %v1179_v43 }
 0x64b   :  { %1249 = vmatprep.subr.bf16.mxu0 %v1182_v40 }
 0x64c   :  { %1250 = vmatpush1.bf16.msra.mxu0 %v1181_v7 }
 0x64d   :  { %1430 = vmatmul.mubr.msk.bf16.vlgmr.msra.gmra.mrb[20].mxu1 %vm1200_vm5, %v1701_v9 }
 0x64f   :  { %1431 = vmatmul.mubr.msk.bf16.vlgmr.msra.gmra.mrb[24].mxu0 %vm1200_vm5, %v1701_v9 }
 0x720   :  { %v1238_v50 = vpop.f32.mrb[20].mxu1 }
 0x721   :  { %v1239_v52 = vadd.f32 %v1238_v50, %v1188_v15  ;;  %v1240_v49 = vpop.f32.mrb[21].mxu1 }
 0x722   :  { %v1281_v53 = vpop.f32.mrb[24].mxu0  ;;  %v1241_v54 = vadd.f32 %v1240_v49, %v1188_v15  ;;  %v1242_v1 = vpop.f32.mrb[22].mxu1 }
 0x723   :  { %v1282_v0 = vadd.f32 %v1281_v53, %v1188_v15  ;;  %v1283_v18 = vpop.f32.mrb[25].mxu0  ;;  %v1290_v61 = vmax.f32 %v1239_v52, 0.0  ;;  %v1243_v11 = vadd.f32 %v1242_v1, %v1193_v45  ;;  %v1244_v19 = vpop.f32.mrb[23].mxu1 }
 0x724   :  { %v1284_v16 = vadd.f32 %v1283_v18, %v1188_v15  ;;  %v1285_v51 = vpop.f32.mrb[26].mxu0  ;;  %v1291_v24 = vmax.f32 %v1241_v54, 0.0  ;;  %v1245_v12 = vadd.f32 %v1244_v19, %v1193_v45 }
 0x725   :  { %v1292_v20 = vmax.f32 %v1282_v0, 0.0  ;;  %v1286_v21 = vadd.f32 %v1285_v51, %v1193_v45  ;;  %v1287_v55 = vpop.f32.mrb[27].mxu0  ;;  %v1298_v57 = vmul.f32 0.1, %v1290_v61  ;;  %v1294_v22 = vmax.f32 %v1243_v11, 0.0 }
 0x726   :  { %v1293_v23 = vmax.f32 %v1284_v16, 0.0  ;;  %v1288_v25 = vadd.f32 %v1287_v55, %v1193_v45  ;;  %v1299_v26 = vmul.f32 0.1, %v1291_v24  ;;  %v1295_v28 = vmax.f32 %v1245_v12, 0.0 }
 0x727   :  { %v1300_v27 = vmul.f32 0.1, %v1292_v20  ;;  %v1296_v63 = vmax.f32 %v1286_v21, 0.0  ;;  %v1306_v30 = vadd.f32 %v1298_v57, %v1853_v34  ;;  %v1302_v32 = vmul.f32 0.1, %v1294_v22  ;;  %v1713_v34 = vld [vmem:[%s2318_s0 + $0x18] sm:$0xff] }
 0x728   :  { %v1301_v8 = vmul.f32 0.1, %v1293_v23  ;;  %v1297_v46 = vmax.f32 %v1288_v25, 0.0  ;;  %v1307_v3 = vadd.f32 %v1712_v2, %v1299_v26  ;;  %v1303_v5 = vmul.f32 0.1, %v1295_v28 }
 0x729   :  { %v1308_v4 = vadd.f32 %v1300_v27, %v1858_v35  ;;  %v1304_v10 = vmul.f32 0.1, %v1296_v63  ;;  %1314 = vst [vmem:[%s2333_s15] sm:$0xff] %v1306_v30  ;;  %v1310_v58 = vadd.f32 %v1302_v32, %v1876_v38 }
 0x72a   :  { %v1309_v60 = vadd.f32 %v1713_v34, %v1301_v8  ;;  %v1305_v6 = vmul.f32 0.1, %v1297_v46  ;;  %1315 = vst [vmem:[%s2333_s15 + $0x8] sm:$0xff] %v1307_v3  ;;  %v1311_v35 = vadd.f32 %v1303_v5, %v1863_v36 }
 0x72b   :  { %1316 = vst [vmem:[%s2333_s15 + $0x10] sm:$0xff] %v1308_v4  ;;  %v1312_v17 = vadd.f32 %v1304_v10, %v1882_v39  ;;  %1318 = vst [vmem:[%s2333_s15 + $0x20] sm:$0xff] %v1310_v58 }
 0x72c   :  { %1317 = vst [vmem:[%s2333_s15 + $0x18] sm:$0xff] %v1309_v60  ;;  %v1313_v38 = vadd.f32 %v1305_v6, %v1868_v37  ;;  %1319 = vst [vmem:[%s2333_s15 + $0x28] sm:$0xff] %v1311_v35 }
 0x72d   :  { %1320 = vst [vmem:[%s2333_s15 + $0x30] sm:$0xff] %v1312_v17 }
 0x72e   :  { %1321 = vst [vmem:[%s2333_s15 + $0x38] sm:$0xff] %v1313_v38 }
 0x72f   :  { %1326 = vsyncpa [#allocation3], 1 }

</bundles_post_ra>
